<compile_context>
chip_gen: v7x
topology: tpu7x:2x2x1
jax: 0.10.0
libtpu: 0.0.40
codegen_flags: <defaults>
</compile_context>

<pallas_src>
import jax
import jax.numpy as jnp
from jax import lax
from jax.experimental import pallas as pl
from jax.experimental.pallas import tpu as pltpu

X_DIM, H1, H2, Z_DIM = 30, 128, 64, 2

LANES = 128          # lane width; every padded block is 128 lanes wide
L_STRIDE = 136       # per-layer rows in the packed weight slab: 128 W rows + 8 bias/pad rows
N_LAYERS = 6         # fc1, fc2, fused(fc31|fc32), fc4, fc5, fc6
MU_COL = 32          # mu lives at lanes [32, 34)
LV_COL = 34          # log_var lives at lanes [34, 36)


def _round_up(a, m):
    return ((a + m - 1) // m) * m


# --------------------------------------------------------------------------
# Kernel
# --------------------------------------------------------------------------
def _vae_kernel(xin_ref, w_ref, out_ref):
    def W(i):                       # 128x128 lane/row-padded weight block of layer i
        off = i * L_STRIDE
        return w_ref[off:off + 128, :]

    def Bv(i):                      # (1, 128) zero-padded bias row of layer i
        off = i * L_STRIDE + 128
        return w_ref[off:off + 1, :]

    x = xin_ref[...]                # (tb, 128): lanes 0:30 = x, lanes 32:34 = eps

    # ---- encoder (lane-padded, full-width MXU matmuls; padded lanes stay 0) ----
    h = jnp.maximum(jnp.dot(x, W(0), preferred_element_type=jnp.float32) + Bv(0), 0.0)
    h = jnp.maximum(jnp.dot(h, W(1), preferred_element_type=jnp.float32) + Bv(1), 0.0)
    # fused fc31|fc32 head; columns pre-placed so mu -> 32:34, log_var -> 34:36, rest 0
    mu_lv = jnp.dot(h, W(2), preferred_element_type=jnp.float32) + Bv(2)

    # ---- reparameterization: z = eps * exp(0.5 * log_var) + mu (per z column) ----
    mu0, mu1 = mu_lv[:, MU_COL:MU_COL + 1], mu_lv[:, MU_COL + 1:MU_COL + 2]
    lv0, lv1 = mu_lv[:, LV_COL:LV_COL + 1], mu_lv[:, LV_COL + 1:LV_COL + 2]
    eps0, eps1 = x[:, MU_COL:MU_COL + 1], x[:, MU_COL + 1:MU_COL + 2]
    z0 = eps0 * jnp.exp(0.5 * lv0) + mu0            # (tb, 1)
    z1 = eps1 * jnp.exp(0.5 * lv1) + mu1            # (tb, 1)

    # ---- decoder: K=2 first projection on the VPU (broadcast FMAs, no MXU pass) ----
    w4_rows = w_ref[3 * L_STRIDE:3 * L_STRIDE + 2, :]          # (2, 128)
    d = z0 * w4_rows[0:1, :] + z1 * w4_rows[1:2, :] + Bv(3)
    d = jnp.maximum(d, 0.0)
    d = jnp.maximum(jnp.dot(d, W(4), preferred_element_type=jnp.float32) + Bv(4), 0.0)
    logits = jnp.dot(d, W(5), preferred_element_type=jnp.float32) + Bv(5)
    recon = jax.nn.sigmoid(logits)                  # valid in lanes 0:30

    # ---- single lane-dense output slab: recon (0:30) | mu (32:34) | log_var (34:36) ----
    lane = lax.broadcasted_iota(jnp.int32, recon.shape, 1)
    out_ref[...] = jnp.where(lane < X_DIM, recon, mu_lv)


# --------------------------------------------------------------------------
# Host-side packing / wrapper
# --------------------------------------------------------------------------
def _place(w, b, col_off=0):
    """One (L_STRIDE, 128) block: weight rows at the top, bias in row 128."""
    blk = jnp.zeros((L_STRIDE, LANES), jnp.float32)
    blk = blk.at[:w.shape[0], col_off:col_off + w.shape[1]].set(w)
    blk = blk.at[128, col_off:col_off + b.shape[-1]].set(b.reshape(-1))
    return blk


def pack_params(params):
    """Pack all layer weights/biases into one (N_LAYERS*L_STRIDE, 128) f32 array."""
    (w1, b1, w2, b2, w31, b31, w32, b32, w4, b4, w5, b5, w6, b6) = params
    w3 = jnp.concatenate([w31, w32], axis=1)        # (H2, 2*Z_DIM)
    b3 = jnp.concatenate([b31, b32], axis=1)        # (1, 2*Z_DIM)
    blocks = [
        _place(w1, b1),                 # layer 0: fc1   (30 -> 128)
        _place(w2, b2),                 # layer 1: fc2   (128 -> 64, lane-padded)
        _place(w3, b3, col_off=MU_COL), # layer 2: fused fc31|fc32 -> lanes 32:36
        _place(w4, b4),                 # layer 3: fc4   (used via VPU FMA, rows 0..1)
        _place(w5, b5),                 # layer 4: fc5   (64 -> 128)
        _place(w6, b6),                 # layer 5: fc6   (128 -> 30, lane-padded)
    ]
    return jnp.concatenate(blocks, axis=0)          # (816, 128)


def vae_forward(x, eps, wpack, *, tb=256):
    """x: (B, X_DIM) f32, eps: (B, Z_DIM) f32, wpack: pack_params(params).

    Returns (recon, mu, log_var) with the same semantics as the PyTorch VAE.forward.
    """
    B = x.shape[0]
    tb = max(8, min(tb, _round_up(B, 8)))           # multiple of 8, no bigger than needed
    B_pad = _round_up(B, tb)
    grid = (B_pad // tb,)

    # Single lane-dense input slab: lanes 0:30 = x, lanes 32:34 = eps, rest zero.
    xin = jnp.zeros((B_pad, LANES), jnp.float32)
    xin = xin.at[:B, :X_DIM].set(x)
    xin = xin.at[:B, MU_COL:MU_COL + Z_DIM].set(eps)

    out = pl.pallas_call(
        _vae_kernel,
        out_shape=jax.ShapeDtypeStruct((B_pad, LANES), jnp.float32),
        grid_spec=pltpu.PrefetchScalarGridSpec(
            num_scalar_prefetch=0,
            grid=grid,
            in_specs=[
                pl.BlockSpec((tb, LANES), lambda i: (i, 0)),                  # x|eps slab
                pl.BlockSpec((N_LAYERS * L_STRIDE, LANES), lambda i: (0, 0)),  # packed weights
            ],
            out_specs=pl.BlockSpec((tb, LANES), lambda i: (i, 0)),
        ),
        compiler_params=pltpu.CompilerParams(
            dimension_semantics=("parallel",)),
    )(xin, wpack)

    recon = out[:B, :X_DIM]
    mu = out[:B, MU_COL:MU_COL + Z_DIM]
    log_var = out[:B, LV_COL:LV_COL + Z_DIM]
    return recon, mu, log_var


# --------------------------------------------------------------------------
# Deterministic PyTorch-style init + pure-JAX reference
# --------------------------------------------------------------------------
def init_params(key):
    """PyTorch-style Linear init; weights stored (in_features, out_features)."""
    dims = [
        (X_DIM, H1),   # fc1
        (H1, H2),      # fc2
        (H2, Z_DIM),   # fc31
        (H2, Z_DIM),   # fc32
        (Z_DIM, H2),   # fc4
        (H2, H1),      # fc5
        (H1, X_DIM),   # fc6
    ]
    params = []
    for (fan_in, fan_out) in dims:
        key, kw, kb = jax.random.split(key, 3)
        bound = 1.0 / jnp.sqrt(jnp.float32(fan_in))
        w = jax.random.uniform(kw, (fan_in, fan_out), jnp.float32, -bound, bound)
        b = jax.random.uniform(kb, (1, fan_out), jnp.float32, -bound, bound)
        params += [w, b]
    return tuple(params)


def reference_forward(x, eps, params):
    """Pure-JAX reference of the PyTorch module's forward."""
    (w1, b1, w2, b2, w31, b31, w32, b32, w4, b4, w5, b5, w6, b6) = params
    h = jax.nn.relu(x @ w1 + b1)
    h = jax.nn.relu(h @ w2 + b2)
    mu = h @ w31 + b31
    log_var = h @ w32 + b32
    z = eps * jnp.exp(0.5 * log_var) + mu
    d = jax.nn.relu(z @ w4 + b4)
    d = jax.nn.relu(d @ w5 + b5)
    recon = jax.nn.sigmoid(d @ w6 + b6)
    return recon, mu, log_var


if __name__ == "__main__":
    key = jax.random.PRNGKey(0)
    kp, kx, ke = jax.random.split(key, 3)

    B = 256                       # small demo batch; tb=128 -> grid of 2 (both TCs on v7x)
    params = init_params(kp)
    wpack = pack_params(params)
    x = jax.random.normal(kx, (B, X_DIM), jnp.float32)
    # torch.randn_like(std) equivalent, sampled outside the kernel:
    eps = jax.random.normal(ke, (B, Z_DIM), jnp.float32)

    recon, mu, log_var = jax.block_until_ready(vae_forward(x, eps, wpack, tb=128))

    # sanity check against the pure-JAX reference
    r_ref, mu_ref, lv_ref = reference_forward(x, eps, params)
    assert recon.shape == (B, X_DIM) and mu.shape == (B, Z_DIM) and log_var.shape == (B, Z_DIM)
    assert jnp.allclose(recon, r_ref, atol=1e-5)
    assert jnp.allclose(mu, mu_ref, atol=1e-5)
    assert jnp.allclose(log_var, lv_ref, atol=1e-5)

    print("KERNEL_OK")
</pallas_src>

<mosaic_0001>
module attributes {stable_mosaic.version = 11 : i64} {
  func.func @_vae_kernel(%arg0: i32, %arg1: memref<128x128xf32, #tpu.memory_space<vmem>>, %arg2: memref<816x128xf32, #tpu.memory_space<vmem>>, %arg3: memref<128x128xf32, #tpu.memory_space<vmem>>) attributes {dimension_semantics = [#tpu.dimension_semantics<parallel>], iteration_bounds = array<i64: 2>, scalar_prefetch = 0 : i64, scratch_operands = 0 : i64, tpu.core_type = #tpu.core_type<tc>, window_params = [{transform_indices = @transform_0, window_bounds = array<i64: 128, 128>}, {pipeline_mode = #tpu.pipeline_mode<synchronous>, transform_indices = @transform_1, window_bounds = array<i64: 816, 128>}, {transform_indices = @transform_2, window_bounds = array<i64: 128, 128>}]} {
    %c0 = arith.constant 0 : index
    %c0_0 = arith.constant 0 : index
    %0 = vector.load %arg1[%c0, %c0_0] : memref<128x128xf32, #tpu.memory_space<vmem>>, vector<128x128xf32>
    %c0_1 = arith.constant 0 : index
    %c0_2 = arith.constant 0 : index
    %1 = vector.load %arg2[%c0_1, %c0_2] : memref<816x128xf32, #tpu.memory_space<vmem>>, vector<128x128xf32>
    %cst = arith.constant dense<0.000000e+00> : vector<128x128xf32>
    %2 = tpu.matmul %0, %1, %cst {dimension_numbers = #tpu.dot_dimension_numbers<[1], [0], [0], [1], [0, 0, 1, 1], [], []>} : vector<128x128xf32>, vector<128x128xf32>, vector<128x128xf32> -> vector<128x128xf32>
    %c128 = arith.constant 128 : index
    %c0_3 = arith.constant 0 : index
    %3 = vector.load %arg2[%c128, %c0_3] : memref<816x128xf32, #tpu.memory_space<vmem>>, vector<1x128xf32>
    %4 = vector.broadcast %3 : vector<1x128xf32> to vector<128x128xf32>
    %5 = arith.addf %2, %4 : vector<128x128xf32>
    %cst_4 = arith.constant 0.000000e+00 : f32
    %6 = vector.broadcast %cst_4 : f32 to vector<128x128xf32>
    %7 = arith.maximumf %5, %6 : vector<128x128xf32>
    %c136 = arith.constant 136 : index
    %c0_5 = arith.constant 0 : index
    %8 = vector.load %arg2[%c136, %c0_5] : memref<816x128xf32, #tpu.memory_space<vmem>>, vector<128x128xf32>
    %cst_6 = arith.constant dense<0.000000e+00> : vector<128x128xf32>
    %9 = tpu.matmul %7, %8, %cst_6 {dimension_numbers = #tpu.dot_dimension_numbers<[1], [0], [0], [1], [0, 0, 1, 1], [], []>} : vector<128x128xf32>, vector<128x128xf32>, vector<128x128xf32> -> vector<128x128xf32>
    %c264 = arith.constant 264 : index
    %c0_7 = arith.constant 0 : index
    %10 = vector.load %arg2[%c264, %c0_7] : memref<816x128xf32, #tpu.memory_space<vmem>>, vector<1x128xf32>
    %11 = vector.broadcast %10 : vector<1x128xf32> to vector<128x128xf32>
    %12 = arith.addf %9, %11 : vector<128x128xf32>
    %cst_8 = arith.constant 0.000000e+00 : f32
    %13 = vector.broadcast %cst_8 : f32 to vector<128x128xf32>
    %14 = arith.maximumf %12, %13 : vector<128x128xf32>
    %c272 = arith.constant 272 : index
    %c0_9 = arith.constant 0 : index
    %15 = vector.load %arg2[%c272, %c0_9] : memref<816x128xf32, #tpu.memory_space<vmem>>, vector<128x128xf32>
    %cst_10 = arith.constant dense<0.000000e+00> : vector<128x128xf32>
    %16 = tpu.matmul %14, %15, %cst_10 {dimension_numbers = #tpu.dot_dimension_numbers<[1], [0], [0], [1], [0, 0, 1, 1], [], []>} : vector<128x128xf32>, vector<128x128xf32>, vector<128x128xf32> -> vector<128x128xf32>
    %c400 = arith.constant 400 : index
    %c0_11 = arith.constant 0 : index
    %17 = vector.load %arg2[%c400, %c0_11] : memref<816x128xf32, #tpu.memory_space<vmem>>, vector<1x128xf32>
    %18 = vector.broadcast %17 : vector<1x128xf32> to vector<128x128xf32>
    %19 = arith.addf %16, %18 : vector<128x128xf32>
    %20 = vector.extract_strided_slice %19 {offsets = [0, 32], sizes = [128, 1], strides = [1, 1]} : vector<128x128xf32> to vector<128x1xf32>
    %21 = vector.extract_strided_slice %19 {offsets = [0, 33], sizes = [128, 1], strides = [1, 1]} : vector<128x128xf32> to vector<128x1xf32>
    %22 = vector.extract_strided_slice %19 {offsets = [0, 34], sizes = [128, 1], strides = [1, 1]} : vector<128x128xf32> to vector<128x1xf32>
    %23 = vector.extract_strided_slice %19 {offsets = [0, 35], sizes = [128, 1], strides = [1, 1]} : vector<128x128xf32> to vector<128x1xf32>
    %24 = vector.extract_strided_slice %0 {offsets = [0, 32], sizes = [128, 1], strides = [1, 1]} : vector<128x128xf32> to vector<128x1xf32>
    %25 = vector.extract_strided_slice %0 {offsets = [0, 33], sizes = [128, 1], strides = [1, 1]} : vector<128x128xf32> to vector<128x1xf32>
    %cst_12 = arith.constant 5.000000e-01 : f32
    %26 = vector.broadcast %cst_12 : f32 to vector<128x1xf32>
    %27 = arith.mulf %26, %22 : vector<128x1xf32>
    %28 = math.exp %27 : vector<128x1xf32>
    %29 = arith.mulf %24, %28 : vector<128x1xf32>
    %30 = arith.addf %29, %20 : vector<128x1xf32>
    %cst_13 = arith.constant 5.000000e-01 : f32
    %31 = vector.broadcast %cst_13 : f32 to vector<128x1xf32>
    %32 = arith.mulf %31, %23 : vector<128x1xf32>
    %33 = math.exp %32 : vector<128x1xf32>
    %34 = arith.mulf %25, %33 : vector<128x1xf32>
    %35 = arith.addf %34, %21 : vector<128x1xf32>
    %c408 = arith.constant 408 : index
    %c0_14 = arith.constant 0 : index
    %36 = vector.load %arg2[%c408, %c0_14] : memref<816x128xf32, #tpu.memory_space<vmem>>, vector<2x128xf32>
    %37 = vector.extract_strided_slice %36 {offsets = [0, 0], sizes = [1, 128], strides = [1, 1]} : vector<2x128xf32> to vector<1x128xf32>
    %38 = vector.broadcast %30 : vector<128x1xf32> to vector<128x128xf32>
    %39 = vector.broadcast %37 : vector<1x128xf32> to vector<128x128xf32>
    %40 = arith.mulf %38, %39 : vector<128x128xf32>
    %41 = vector.extract_strided_slice %36 {offsets = [1, 0], sizes = [1, 128], strides = [1, 1]} : vector<2x128xf32> to vector<1x128xf32>
    %42 = vector.broadcast %35 : vector<128x1xf32> to vector<128x128xf32>
    %43 = vector.broadcast %41 : vector<1x128xf32> to vector<128x128xf32>
    %44 = arith.mulf %42, %43 : vector<128x128xf32>
    %45 = arith.addf %40, %44 : vector<128x128xf32>
    %c536 = arith.constant 536 : index
    %c0_15 = arith.constant 0 : index
    %46 = vector.load %arg2[%c536, %c0_15] : memref<816x128xf32, #tpu.memory_space<vmem>>, vector<1x128xf32>
    %47 = vector.broadcast %46 : vector<1x128xf32> to vector<128x128xf32>
    %48 = arith.addf %45, %47 : vector<128x128xf32>
    %cst_16 = arith.constant 0.000000e+00 : f32
    %49 = vector.broadcast %cst_16 : f32 to vector<128x128xf32>
    %50 = arith.maximumf %48, %49 : vector<128x128xf32>
    %c544 = arith.constant 544 : index
    %c0_17 = arith.constant 0 : index
    %51 = vector.load %arg2[%c544, %c0_17] : memref<816x128xf32, #tpu.memory_space<vmem>>, vector<128x128xf32>
    %cst_18 = arith.constant dense<0.000000e+00> : vector<128x128xf32>
    %52 = tpu.matmul %50, %51, %cst_18 {dimension_numbers = #tpu.dot_dimension_numbers<[1], [0], [0], [1], [0, 0, 1, 1], [], []>} : vector<128x128xf32>, vector<128x128xf32>, vector<128x128xf32> -> vector<128x128xf32>
    %c672 = arith.constant 672 : index
    %c0_19 = arith.constant 0 : index
    %53 = vector.load %arg2[%c672, %c0_19] : memref<816x128xf32, #tpu.memory_space<vmem>>, vector<1x128xf32>
    %54 = vector.broadcast %53 : vector<1x128xf32> to vector<128x128xf32>
    %55 = arith.addf %52, %54 : vector<128x128xf32>
    %cst_20 = arith.constant 0.000000e+00 : f32
    %56 = vector.broadcast %cst_20 : f32 to vector<128x128xf32>
    %57 = arith.maximumf %55, %56 : vector<128x128xf32>
    %c680 = arith.constant 680 : index
    %c0_21 = arith.constant 0 : index
    %58 = vector.load %arg2[%c680, %c0_21] : memref<816x128xf32, #tpu.memory_space<vmem>>, vector<128x128xf32>
    %cst_22 = arith.constant dense<0.000000e+00> : vector<128x128xf32>
    %59 = tpu.matmul %57, %58, %cst_22 {dimension_numbers = #tpu.dot_dimension_numbers<[1], [0], [0], [1], [0, 0, 1, 1], [], []>} : vector<128x128xf32>, vector<128x128xf32>, vector<128x128xf32> -> vector<128x128xf32>
    %c808 = arith.constant 808 : index
    %c0_23 = arith.constant 0 : index
    %60 = vector.load %arg2[%c808, %c0_23] : memref<816x128xf32, #tpu.memory_space<vmem>>, vector<1x128xf32>
    %61 = vector.broadcast %60 : vector<1x128xf32> to vector<128x128xf32>
    %62 = arith.addf %59, %61 : vector<128x128xf32>
    %63 = arith.negf %62 : vector<128x128xf32>
    %64 = math.exp %63 : vector<128x128xf32>
    %cst_24 = arith.constant 1.000000e+00 : f32
    %65 = vector.broadcast %cst_24 : f32 to vector<128x128xf32>
    %66 = arith.addf %65, %64 : vector<128x128xf32>
    %67 = arith.divf %65, %66 : vector<128x128xf32>
    %68 = tpu.iota {dimensions = array<i32: 1>} : vector<128x128xi32>
    %c30_i32 = arith.constant 30 : i32
    %69 = vector.broadcast %c30_i32 : i32 to vector<128x128xi32>
    %70 = arith.cmpi slt, %68, %69 : vector<128x128xi32>
    %71 = arith.select %70, %67, %19 : vector<128x128xi1>, vector<128x128xf32>
    %c0_25 = arith.constant 0 : index
    %c0_26 = arith.constant 0 : index
    %72 = vector.load %arg3[%c0_25, %c0_26] : memref<128x128xf32, #tpu.memory_space<vmem>>, vector<128x128xf32>
    tpu.vector_store %arg3[%c0_25, %c0_26], %71 {strides = array<i32>} : memref<128x128xf32, #tpu.memory_space<vmem>>, vector<128x128xf32>,
    return
  }
  func.func @transform_0(%arg0: i32) -> (i32, i32) {
    %c0_i32 = arith.constant 0 : i32
    %c0_i32_0 = arith.constant 0 : i32
    return %arg0, %c0_i32 : i32, i32
  }
  func.func @transform_1(%arg0: i32) -> (i32, i32) {
    %c0_i32 = arith.constant 0 : i32
    %c0_i32_0 = arith.constant 0 : i32
    %c0_i32_1 = arith.constant 0 : i32
    return %c0_i32, %c0_i32_0 : i32, i32
  }
  func.func @transform_2(%arg0: i32) -> (i32, i32) {
    %c0_i32 = arith.constant 0 : i32
    %c0_i32_0 = arith.constant 0 : i32
    return %arg0, %c0_i32 : i32, i32
  }
}

</mosaic_0001>

<bundles_post_ra>
// kernel: tpu_custom_call.1
= control target key start
LH: loop header
LB: loop body
LE: loop exit
PB: predicated region body
PF: predicated region fallthrough
CT: control target
= control target key end

     0   :  { %7 = vsyncpa [#allocation3], 0  ;;  %s3275_s0 = inlined_call_operand.hbm [shape: f32[256,128], index: 0, kind: input, shape index: {}]   ;;  %s3276_s1 = inlined_call_operand.hbm [shape: f32[816,128], index: 1, kind: input, shape index: {}]   ;;  %s3277_s2 = inlined_call_operand.hbm [shape: f32[256,128], index: 2, kind: output, shape index: {}]  }
   0x1   :  { %9 = vsyncpa [#allocation3 + $0x1], 0 }
   0x2   :  { %10 = vsyncpa [#allocation6], 0 }
   0x3   :  { %11 = vsyncpa [#allocation4], 0 }
   0x4   :  { %13 = vsyncpa [#allocation4 + $0x1], 0  ;;  %s2679_s9 = smov 0   ;;  %s2681_s10 = smov 0  }
   0x5   :  { %s2683_s11 = smov 0   ;;  %s2685_s12 = smov 0  }
   0x6 LB: > { %s2700_s13 = sadd.s32 4294967295, %s2652_s12   ;;  %s1683_s14 = sadd.s32 4294967294, %s2652_s12   ;;  %s2652_s12 = sphi %s2685_s12, %s3297_s12   ;;  %s2648_s11 = sphi %s2683_s11, %s3296_s11   ;;  %s2644_s10 = sphi %s2681_s10, %s3295_s10   ;;  %s2640_s9 = sphi %s2679_s9, %s3294_s9  }
   0x7   : > { %p39_p0 = scmp.ne.s32.totalorder %s2644_s10, %s2640_s9  ;;  %p3278_p1 = scmp.eq.s32.totalorder %s2700_s13, 0 }
   0x8   : > { %p90_p3 = scmp.eq.s32.totalorder %s1683_s14, 1  ;;  %p1684_p5 = scmp.ge.s32.totalorder %s2652_s12, 1 }
   0x9   : > { %p2709_p4 = por %p3278_p1, %p39_p0  ;;  %p97_p7 = scmp.lt.s32.totalorder %s2652_s12, 3 }
   0xa   : > { %p2714_p6 = por %p90_p3, %p39_p0  ;;  %s2654_s18 = smov [#allocation5]  }
   0xb   : > { %s3281_s15 = scalar_select %p2709_p4, 1, 0 }
   0xc   : > { %s3282_s16 = scalar_select %p2714_p6, 1, 0 }
   0xd   : > { %p2719_p8 = pnand %p1684_p5, %p97_p7  ;;  %s109_s19 = sshll.u32 %s2654_s18, 4  ;;  %s2723_s19 = int_to_ptr.vmem [resolvable:$true] %s109_s19 }
   0xe   : > { %s2735_s21 = sadd.s32 1, %s2652_s12   ;;  %s26_s22 = sadd.s32 1, %s2648_s11 }
   0xf   : > { %s3283_s17 = scalar_select %p2719_p8, 1, 0 }
  0x10   : > { %p2347_p9 = pneg %p2719_p8  ;;  %s23_s23 = ssub.s32 %s2652_s12, %s2735_s21 }
  0x11   : > { %s2524_s26 = scalar_lea.hbm %s3276_s1, 13056 }
  0x12   : > { %p2730_p11 = pnand %p2347_p9, %p3278_p1  ;;  %p2525_p12 = scmp.ne.s32.totalorder %s3276_s1, %s2524_s26 }
  0x13   : > { %p2531_p5 = scmp.lt.u32.totalorder %s2524_s26, %s3276_s1 }
  0x14   : > { %p2526_p13 = pneg %p2730_p11 }
  0x16   : > { %p2527_p0 = pnand %p2526_p13, %p2525_p12 }
  0x18   : > { %p2528_p3 = pneg %p2527_p0 }
  0x1a   : > { %p2533_p7 = pnand %p2531_p5, %p2528_p3 }
  0x1c   : > { %2536 = shalt.err (!%p2533_p7)
}
  0x1d   : > { %s2537_s3 = scalar_lea.vmem %s2723_s19, 13056  ;;  %p2545_p2 = scmp.lt.s32.totalorder %s2723_s19, %s2723_s19 }
  0x1e   : > { %p2538_p9 = scmp.ne.s32.totalorder %s2723_s19, %s2537_s3  ;;  %p2546_p6 = scmp.lt.s32.totalorder %s2537_s3, %s2537_s3 }
  0x20   : > { %p2540_p10 = pnand %p2538_p9, %p2526_p13  ;;  %p2547_p4 = por %p2546_p6, %p2545_p2 }
  0x22   : > { %p2541_p1 = pneg %p2540_p10 }
  0x24   : > { %p2548_p8 = pnand %p2547_p4, %p2541_p1 }
  0x26   : > { %2551 = shalt.err (!%p2548_p8)
}
  0x27   : > { %s2655_s4 = smov 128   ;;  %s2656_s5 = smov 8  }
  0x28   : > { %2350 = dma.hbm_to_vmem [thread:$0]  (!%p2730_p11), %s3276_s1, 13056, %s2723_s19, [#allocation6], %s2655_s4, %s2655_s4, %s2656_s5  }
  0x29   : > { %p24_p1 = scmp.eq.s32.totalorder %s23_s23, 0  ;;  %p33_p2 = scmp.ne.s32.totalorder %s2648_s11, %s2644_s10 }
  0x2a   : > { %p34_p4 = scmp.eq.s32.totalorder %s2652_s12, 0  ;;  %p2360_p6 = scmp.lt.s32.totalorder %s2652_s12, 2 }
  0x2b   : > { %s2769_s8 = scalar_select %p24_p1, %s2648_s11, %s26_s22  }
  0x2c   : > { %p35_p8 = por %p34_p4, %p33_p2  ;;  %p3285_p10 = scmp.eq.s32.totalorder %s2700_s13, 1 }
  0x2d   : > { %s123_s18 = sand.u32 1, %s2648_s11   ;;  %s1721_s20 = sshll.u32 %s2652_s12, 11 }
  0x2e   : > { %p2773_p12 = por %p3285_p10, %p33_p2  ;;  %s1687_s24 = sshll.u32 %s123_s18, 7 }
  0x2f   : > { %s2782_s27 = scalar_lea.hbm %s3275_s0, %s1721_s20  ;;  %s127_s19 = scalar_lea.vmem [#allocation2], %s1687_s24 }
  0x30   : > { %s134_s22 = sshll.u32 %s127_s19, 4  ;;  %p2784_p11 = pnand %p2360_p6, %p35_p8  ;;  %s2788_s22 = int_to_ptr.vmem [resolvable:$true] %s134_s22 }
  0x31   : > { %s2790_s28 = scalar_lea.sflag [#allocation3], %s123_s18  ;;  %s2552_s29 = scalar_lea.hbm %s2782_s27, 2048 }
  0x32   : > { %p2553_p13 = scmp.ne.s32.totalorder %s2782_s27, %s2552_s29  ;;  %p2554_p0 = pneg %p2784_p11 }
  0x33   : > { %s2557_s6 = scalar_lea.hbm %s3275_s0, 4096  ;;  %p2558_p7 = scmp.lt.u32.totalorder %s2782_s27, %s3275_s0 }
  0x34   : > { %p2555_p3 = pnand %p2554_p0, %p2553_p13  ;;  %p2559_p9 = scmp.lt.u32.totalorder %s2557_s6, %s2552_s29 }
  0x35   : > { %p2561_p2 = scmp.lt.u32.totalorder %s2552_s29, %s2782_s27 }
  0x36   : > { %p2556_p5 = pneg %p2555_p3  ;;  %p2560_p1 = por %p2559_p9, %p2558_p7 }
  0x38   : > { %p2562_p4 = por %p2561_p2, %p2560_p1 }
  0x3a   : > { %p2563_p6 = pnand %p2562_p4, %p2556_p5 }
  0x3c   : > { %2566 = shalt.err (!%p2563_p6)
}
  0x3d   : > { %s2567_s18 = scalar_lea.vmem %s2788_s22, 2048  ;;  %s2657_s24 = smov [#allocation2]  }
  0x3e   : > { %p2568_p8 = scmp.ne.s32.totalorder %s2788_s22, %s2567_s18  ;;  %s2572_s25 = sshll.u32 %s2657_s24, 4  ;;  %s2573_s25 = int_to_ptr.vmem [resolvable:$false] %s2572_s25 }
  0x3f   : > { %s2574_s26 = scalar_lea.vmem %s2573_s25, 4096  ;;  %p2575_p3 = scmp.lt.s32.totalorder %s2788_s22, %s2573_s25 }
  0x40   : > { %p2570_p10 = pnand %p2568_p8, %p2554_p0  ;;  %p2576_p7 = scmp.lt.s32.totalorder %s2574_s26, %s2567_s18 }
  0x42   : > { %p2571_p13 = pneg %p2570_p10  ;;  %p2577_p9 = por %p2576_p7, %p2575_p3 }
  0x44   : > { %p2578_p1 = pnand %p2577_p9, %p2571_p13 }
  0x46   : > { %2581 = shalt.err (!%p2578_p1)
}
  0x47   : > { %2354 = dma.hbm_to_vmem [thread:$0]  (!%p2784_p11), %s2782_s27, 2048, %s2788_s22, %s2790_s28, %s2655_s4, %s2655_s4, %s2656_s5  }
  0x48   : > { %p3288_p0 = scmp.ne.s32.totalorder %s3283_s17, 0 }
  0x49   : > { %s2824_s19 = sand.u32 (!%p3288_p0), 1, %s2644_s10   ;;  %p3289_p5 = scmp.ne.s32.totalorder (!%p3288_p0), %s3281_s15, 0 }
  0x4a   : > { %146 = sbr.rel (%p3288_p0) target bundleno = 1612 (0x64c), region = 28  ;;  %s1691_s29 = sshll.u32 (!%p3288_p0), %s2824_s19, 7 }
  0x4b   : > { %s149_s30 = scalar_lea.sflag (!%p3288_p0), [#allocation3], %s2824_s19  ;;  %s2830_s23 = scalar_lea.vmem (!%p3288_p0), [#allocation2], %s1691_s29 }
  0x51   : > { %2627 = dma.done.wait (%p3289_p5), %s149_s30, 2048  }
  0x52   : > { %2629 = vsyncadd (%p3289_p5), %s149_s30, 4294965248  ;;  %p3290_p11 = scmp.eq.s32.totalorder %s2700_s13, 0 }
  0x54   : > { %2631 = dma.done.wait (%p3290_p11), [#allocation6], 13056   ;;  %p3291_p2 = pmov %p3290_p11 }
  0x55   : > { %v195_v0 = vld [vmem:[#allocation5] sm:$0xff]  ;;  %v196_v1 = vld [vmem:[#allocation5 + $0x8] sm:$0xff]  ;;  %v197_v2 = vld [vmem:[#allocation5 + $0x10] sm:$0xff]  ;;  %s2660_s15 = smov 126   ;;  %s3149_s17 = scalar_lea.vmem [#allocation7], %s1691_s29 }
  0x56   : > { %2633 = vsyncadd (%p3291_p2), [#allocation6], 4294954240  ;;  %v2163_v3 = vpack.c.bf16 %v196_v1, %v195_v0  ;;  %v198_v4 = vld [vmem:[#allocation5 + $0x18] sm:$0xff]  ;;  %v199_v6 = vld [vmem:[#allocation5 + $0x20] sm:$0xff]  ;;  %s1722_s4 = sshll.u32 %s2700_s13, 11  ;;  %s1600_s5 = sshll.u32 %s3149_s17, 4  ;;  %s3223_s5 = int_to_ptr.vmem [resolvable:$true] %s1600_s5 }
  0x57   : > { %v2167_v5 = vpack.c.bf16 %v198_v4, %v197_v2  ;;  %v200_v7 = vld [vmem:[#allocation5 + $0x28] sm:$0xff]  ;;  %v2841_v9 = vld [vmem:[%s2830_s23] sm:$0xff]  ;;  %v201_v10 = vld [vmem:[#allocation5 + $0x30] sm:$0xff]  ;;  %s3221_s28 = scalar_lea.hbm %s3277_s2, %s1722_s4  ;;  %s1587_s13 = scalar_lea.sflag [#allocation4], %s2824_s19 }
  0x58   : > { %2164 = vmatprep.subr.bf16.mxu0 %v2163_v3  ;;  %v2171_v8 = vpack.c.bf16 %v200_v7, %v199_v6  ;;  %v202_v11 = vld [vmem:[#allocation5 + $0x38] sm:$0xff]  ;;  %1915 = vmatprep.mubr.f32.mxu0 %v2841_v9  ;;  %v203_v13 = vld [vmem:[#allocation5 + $0x40] sm:$0xff]  ;;  %v204_v14 = vld [vmem:[#allocation5 + $0x48] sm:$0xff]  ;;  %s2582_s3 = scalar_lea.vmem %s3223_s5, 2048  ;;  %s2661_s6 = smov [#allocation7]  }
  0x59   : > { %2166 = vmatpush3.bf16.msra.mxu0 %v2163_v3  ;;  %v2175_v12 = vpack.c.bf16 %v202_v11, %v201_v10  ;;  %v377_v15 = vld [vmem:[#allocation5 + $0x88] sm:$0xff]  ;;  %v378_v16 = vld [vmem:[#allocation5 + $0x90] sm:$0xff]  ;;  %v379_v17 = vld [vmem:[#allocation5 + $0x98] sm:$0xff]  ;;  %v2179_v21 = vpack.c.bf16 %v204_v14, %v203_v13  ;;  %p2583_p4 = scmp.ne.s32.totalorder %s3223_s5, %s2582_s3  ;;  %s2586_s7 = sshll.u32 %s2661_s6, 4  ;;  %s2587_s7 = int_to_ptr.vmem [resolvable:$false] %s2586_s7 }
  0x5a   : > { %2168 = vmatprep.subr.bf16.mxu0 %v2167_v5  ;;  %v380_v18 = vld [vmem:[#allocation5 + $0xa0] sm:$0xff]  ;;  %v2195_v19 = vpack.c.bf16 %v378_v16, %v377_v15  ;;  %v381_v22 = vld [vmem:[#allocation5 + $0xa8] sm:$0xff]  ;;  %v382_v23 = vld [vmem:[#allocation5 + $0xb0] sm:$0xff]  ;;  %s2588_s20 = scalar_lea.vmem %s2587_s7, 4096  ;;  %p2589_p10 = scmp.lt.s32.totalorder %s3223_s5, %s2587_s7 }
  0x5b   : > { %v2199_v20 = vpack.c.bf16 %v380_v18, %v379_v17  ;;  %v205_v24 = vld [vmem:[#allocation5 + $0x50] sm:$0xff]  ;;  %v206_v25 = vld [vmem:[#allocation5 + $0x58] sm:$0xff]  ;;  %v2203_v26 = vpack.c.bf16 %v382_v23, %v381_v22  ;;  %v384_v29 = vld [vmem:[#allocation5 + $0xc0] sm:$0xff]  ;;  %p2584_p6 = pnand %p2583_p4, %p2773_p12  ;;  %p2590_p13 = scmp.lt.s32.totalorder %s2588_s20, %s2582_s3 }
  0x5c   : > { %2196 = vmatprep.subr.bf16.mxu1 %v2195_v19  ;;  %v2183_v27 = vpack.c.bf16 %v206_v25, %v205_v24  ;;  %v383_v28 = vld [vmem:[#allocation5 + $0xb8] sm:$0xff]  ;;  %v207_v30 = vld [vmem:[#allocation5 + $0x60] sm:$0xff]  ;;  %v208_v31 = vld [vmem:[#allocation5 + $0x68] sm:$0xff] }
  0x5d   : > { %2170 = vmatpush3.bf16.msra.mxu0 %v2167_v5  ;;  %2198 = vmatpush3.bf16.msra.mxu1 %v2195_v19  ;;  %v2207_v32 = vpack.c.bf16 %v384_v29, %v383_v28  ;;  %v2187_v33 = vpack.c.bf16 %v208_v31, %v207_v30  ;;  %v385_v34 = vld [vmem:[#allocation5 + $0xc8] sm:$0xff]  ;;  %v386_v35 = vld [vmem:[#allocation5 + $0xd0] sm:$0xff]  ;;  %v210_v37 = vld [vmem:[#allocation5 + $0x78] sm:$0xff]  ;;  %p2585_p8 = pneg %p2584_p6  ;;  %p2591_p3 = por %p2590_p13, %p2589_p10 }
  0x5e   : > { %2172 = vmatprep.subr.bf16.mxu0 %v2171_v8  ;;  %2200 = vmatprep.subr.bf16.mxu1 %v2199_v20  ;;  %v209_v36 = vld [vmem:[#allocation5 + $0x70] sm:$0xff]  ;;  %v2211_v38 = vpack.c.bf16 %v386_v35, %v385_v34  ;;  %v387_v40 = vld [vmem:[#allocation5 + $0xd8] sm:$0xff]  ;;  %v388_v41 = vld [vmem:[#allocation5 + $0xe0] sm:$0xff] }
  0x5f   : > { %v2191_v39 = vpack.c.bf16 %v210_v37, %v209_v36  ;;  %v2215_v42 = vpack.c.bf16 %v388_v41, %v387_v40  ;;  %v389_v43 = vld [vmem:[#allocation5 + $0xe8] sm:$0xff]  ;;  %v390_v44 = vld [vmem:[#allocation5 + $0xf0] sm:$0xff]  ;;  %v2853_v48 = vld [vmem:[%s2830_s23 + $0x18] sm:$0xff]  ;;  %p2592_p7 = pnand %p2591_p3, %p2585_p8 }
  0x60   : > { %v2845_v45 = vld [vmem:[%s2830_s23 + $0x8] sm:$0xff]  ;;  %v2219_v46 = vpack.c.bf16 %v390_v44, %v389_v43  ;;  %v2848_v47 = vld [vmem:[%s2830_s23 + $0x10] sm:$0xff]  ;;  %v2856_v49 = vld [vmem:[%s2830_s23 + $0x20] sm:$0xff] }
  0x61   : > { %2174 = vmatpush3.bf16.msra.mxu0 %v2171_v8  ;;  %2202 = vmatpush3.bf16.msra.mxu1 %v2199_v20  ;;  %v2861_v50 = vld [vmem:[%s2830_s23 + $0x28] sm:$0xff]  ;;  %v2864_v51 = vld [vmem:[%s2830_s23 + $0x30] sm:$0xff]  ;;  %v2869_v52 = vld [vmem:[%s2830_s23 + $0x38] sm:$0xff] }
  0x62   : > { %2176 = vmatprep.subr.bf16.mxu0 %v2175_v12  ;;  %2204 = vmatprep.subr.bf16.mxu1 %v2203_v26  ;;  %v2872_v53 = vld [vmem:[%s2830_s23 + $0x40] sm:$0xff]  ;;  %v2877_v54 = vld [vmem:[%s2830_s23 + $0x48] sm:$0xff]  ;;  %v2880_v55 = vld [vmem:[%s2830_s23 + $0x50] sm:$0xff] }
  0x63   : > { %v2885_v56 = vld [vmem:[%s2830_s23 + $0x58] sm:$0xff]  ;;  %v2888_v57 = vld [vmem:[%s2830_s23 + $0x60] sm:$0xff]  ;;  %v2893_v58 = vld [vmem:[%s2830_s23 + $0x68] sm:$0xff] }
  0x64   : > { %v2896_v59 = vld [vmem:[%s2830_s23 + $0x70] sm:$0xff]  ;;  %v2901_v60 = vld [vmem:[%s2830_s23 + $0x78] sm:$0xff]  ;;  %v392_v62 = vld [vmem:[#allocation5 + $0x100] sm:$0xff] }
  0x65   : > { %2178 = vmatpush3.bf16.msra.mxu0 %v2175_v12  ;;  %2206 = vmatpush3.bf16.msra.mxu1 %v2203_v26  ;;  %v391_v61 = vld [vmem:[#allocation5 + $0xf8] sm:$0xff]  ;;  %v559_v0 = vld [vmem:[#allocation5 + $0x110] sm:$0xff]  ;;  %v561_v2 = vld [vmem:[#allocation5 + $0x120] sm:$0xff] }
  0x66   : > { %2180 = vmatprep.subr.bf16.mxu0 %v2179_v21  ;;  %2208 = vmatprep.subr.bf16.mxu1 %v2207_v32  ;;  %v2223_v63 = vpack.c.bf16 %v392_v62, %v391_v61  ;;  %v560_v1 = vld [vmem:[#allocation5 + $0x118] sm:$0xff]  ;;  %v562_v4 = vld [vmem:[#allocation5 + $0x128] sm:$0xff]  ;;  %v563_v6 = vld [vmem:[#allocation5 + $0x130] sm:$0xff] }
  0x67   : > { %v2227_v3 = vpack.c.bf16 %v560_v1, %v559_v0  ;;  %v2231_v5 = vpack.c.bf16 %v562_v4, %v561_v2  ;;  %v564_v7 = vld [vmem:[#allocation5 + $0x138] sm:$0xff]  ;;  %v565_v10 = vld [vmem:[#allocation5 + $0x140] sm:$0xff]  ;;  %v566_v11 = vld [vmem:[#allocation5 + $0x148] sm:$0xff] }
  0x68   : > { %v2235_v8 = vpack.c.bf16 %v564_v7, %v563_v6  ;;  %v2239_v12 = vpack.c.bf16 %v566_v11, %v565_v10  ;;  %v567_v13 = vld [vmem:[#allocation5 + $0x150] sm:$0xff]  ;;  %v568_v14 = vld [vmem:[#allocation5 + $0x158] sm:$0xff]  ;;  %v569_v16 = vld [vmem:[#allocation5 + $0x160] sm:$0xff] }
  0x69   : > { %2182 = vmatpush3.bf16.msra.mxu0 %v2179_v21  ;;  %2210 = vmatpush3.bf16.msra.mxu1 %v2207_v32  ;;  %v2243_v15 = vpack.c.bf16 %v568_v14, %v567_v13  ;;  %v570_v17 = vld [vmem:[#allocation5 + $0x168] sm:$0xff]  ;;  %v571_v19 = vld [vmem:[#allocation5 + $0x170] sm:$0xff]  ;;  %v572_v20 = vld [vmem:[#allocation5 + $0x178] sm:$0xff] }
  0x6a   : > { %2184 = vmatprep.subr.bf16.mxu0 %v2183_v27  ;;  %2212 = vmatprep.subr.bf16.mxu1 %v2211_v38  ;;  %v2247_v18 = vpack.c.bf16 %v570_v17, %v569_v16  ;;  %v2251_v21 = vpack.c.bf16 %v572_v20, %v571_v19  ;;  %v1694_v22 = vld [vmem:[#allocation5 + $0x80] ss:$0 sm:$0xff] }
  0x6d   : > { %2186 = vmatpush3.bf16.msra.mxu0 %v2183_v27  ;;  %2214 = vmatpush3.bf16.msra.mxu1 %v2211_v38 }
  0x6e   : > { %2188 = vmatprep.subr.bf16.mxu0 %v2187_v33  ;;  %2216 = vmatprep.subr.bf16.mxu1 %v2215_v42 }
  0x71   : > { %2190 = vmatpush3.bf16.msra.mxu0 %v2187_v33  ;;  %2218 = vmatpush3.bf16.msra.mxu1 %v2215_v42 }
  0x72   : > { %2192 = vmatprep.subr.bf16.mxu0 %v2191_v39  ;;  %2220 = vmatprep.subr.bf16.mxu1 %v2219_v46 }
  0x75   : > { %2194 = vmatpush3.bf16.msra.mxu0 %v2191_v39  ;;  %2222 = vmatpush3.bf16.msra.mxu1 %v2219_v46 }
  0x76   : > { %2224 = vmatprep.subr.bf16.mxu1 %v2223_v63  ;;  %2228 = vmatprep.subr.bf16.mxu0 %v2227_v3 }
  0x78   : > { %1916 = vmatmul.mubr.f32.vlgmr.msra.gmra.mrb[0].mxu0 %v2845_v45 }
  0x79   : > { %1918 = vmatprep.mubr.f32.mxu0 %v2848_v47  ;;  %2226 = vmatpush3.bf16.msra.mxu1 %v2223_v63 }
  0x7a   : > { %2230 = vmatpush3.bf16.msra.mxu0 %v2227_v3 }
  0x7b   : > { %2232 = vmatprep.subr.bf16.mxu0 %v2231_v5 }
  0x7c   : > { %1919 = vmatmul.mubr.f32.gmra.mrb[2].mxu0 %v2853_v48 }
  0x7d   : > { %1921 = vmatprep.mubr.f32.mxu0 %v2856_v49 }
  0x7e   : > { %2234 = vmatpush3.bf16.msra.mxu0 %v2231_v5 }
  0x7f   : > { %2236 = vmatprep.subr.bf16.mxu0 %v2235_v8 }
  0x80   : > { %1922 = vmatmul.mubr.f32.gmra.mrb[4].mxu0 %v2861_v50 }
  0x81   : > { %1924 = vmatprep.mubr.f32.mxu0 %v2864_v51 }
  0x82   : > { %2238 = vmatpush3.bf16.msra.mxu0 %v2235_v8 }
  0x83   : > { %2240 = vmatprep.subr.bf16.mxu0 %v2239_v12 }
  0x84   : > { %1925 = vmatmul.mubr.f32.gmra.mrb[6].mxu0 %v2869_v52 }
  0x85   : > { %1927 = vmatprep.mubr.f32.mxu0 %v2872_v53 }
  0x86   : > { %2242 = vmatpush3.bf16.msra.mxu0 %v2239_v12 }
  0x87   : > { %2244 = vmatprep.subr.bf16.mxu0 %v2243_v15 }
  0x88   : > { %1928 = vmatmul.mubr.f32.gmra.mrb[8].mxu0 %v2877_v54 }
  0x89   : > { %1930 = vmatprep.mubr.f32.mxu0 %v2880_v55 }
  0x8a   : > { %2246 = vmatpush3.bf16.msra.mxu0 %v2243_v15 }
  0x8b   : > { %2248 = vmatprep.subr.bf16.mxu0 %v2247_v18 }
  0x8c   : > { %1931 = vmatmul.mubr.f32.gmra.mrb[10].mxu0 %v2885_v56 }
  0x8d   : > { %1933 = vmatprep.mubr.f32.mxu0 %v2888_v57 }
  0x8e   : > { %2250 = vmatpush3.bf16.msra.mxu0 %v2247_v18 }
  0x8f   : > { %2252 = vmatprep.subr.bf16.mxu0 %v2251_v21 }
  0x90   : > { %1934 = vmatmul.mubr.f32.gmra.mrb[12].mxu0 %v2893_v58 }
  0x91   : > { %1936 = vmatprep.mubr.f32.mxu0 %v2896_v59 }
  0x92   : > { %2254 = vmatpush3.bf16.msra.mxu0 %v2251_v21 }
  0x94   : > { %1937 = vmatmul.mubr.f32.gmra.mrb[14].mxu0 %v2901_v60 }
 0x14b   : > { %v1917_v23 = vpop.f32.mrb[0].mxu0 }
 0x14c   : > { %v288_v24 = vadd.f32 %v1917_v23, %v1694_v22  ;;  %v282_v25 = vpop.f32.mrb[1].mxu0 }
 0x14d   : > { %v283_v26 = vadd.f32 %v1694_v22, %v282_v25  ;;  %v574_v25 = vld [vmem:[#allocation5 + $0x188] sm:$0xff] }
 0x14e   : > { %v362_v29 = vmax.f32 %v288_v24, 0.0  ;;  %v573_v24 = vld [vmem:[#allocation5 + $0x180] sm:$0xff] }
 0x14f   : > { %v1920_v27 = vpop.f32.mrb[2].mxu0  ;;  %v361_v28 = vmax.f32 %v283_v26, 0.0  ;;  %v2255_v26 = vpack.c.bf16 %v574_v25, %v573_v24 }
 0x150   : > { %v298_v30 = vadd.f32 %v1920_v27, %v1694_v22  ;;  %v292_v31 = vpop.f32.mrb[3].mxu0  ;;  %v1695_v27 = vld [vmem:[#allocation5 + $0x108] ss:$0 sm:$0xff] }
 0x151   : > { %v293_v32 = vadd.f32 %v1694_v22, %v292_v31  ;;  %1971 = vmatprep.mubr.f32.mxu1 %v361_v28  ;;  %2256 = vmatprep.subr.bf16.mxu0 %v2255_v26 }
 0x152   : > { %v364_v33 = vmax.f32 %v298_v30, 0.0  ;;  %1972 = vmatmul.mubr.f32.vlgmr.msra.gmra.mrb[0].mxu1 %v362_v29  ;;  %2258 = vmatpush3.bf16.msra.mxu0 %v2255_v26 }
 0x153   : > { %v363_v34 = vmax.f32 %v293_v32, 0.0  ;;  %v1923_v35 = vpop.f32.mrb[4].mxu0 }
 0x154   : > { %v308_v36 = vadd.f32 %v1923_v35, %v1694_v22  ;;  %v302_v37 = vpop.f32.mrb[5].mxu0 }
 0x155   : > { %v303_v38 = vadd.f32 %v1694_v22, %v302_v37  ;;  %1974 = vmatprep.mubr.f32.mxu1 %v363_v34 }
 0x156   : > { %v366_v39 = vmax.f32 %v308_v36, 0.0  ;;  %1975 = vmatmul.mubr.f32.gmra.mrb[2].mxu1 %v364_v33 }
 0x157   : > { %v365_v40 = vmax.f32 %v303_v38, 0.0  ;;  %v1926_v41 = vpop.f32.mrb[6].mxu0 }
 0x158   : > { %v318_v42 = vadd.f32 %v1926_v41, %v1694_v22  ;;  %v312_v43 = vpop.f32.mrb[7].mxu0 }
 0x159   : > { %v313_v44 = vadd.f32 %v1694_v22, %v312_v43  ;;  %1977 = vmatprep.mubr.f32.mxu1 %v365_v40 }
 0x15a   : > { %v368_v46 = vmax.f32 %v318_v42, 0.0  ;;  %1978 = vmatmul.mubr.f32.gmra.mrb[4].mxu1 %v366_v39 }
 0x15b   : > { %v367_v61 = vmax.f32 %v313_v44, 0.0  ;;  %v1929_v62 = vpop.f32.mrb[8].mxu0 }
 0x15c   : > { %v328_v63 = vadd.f32 %v1929_v62, %v1694_v22  ;;  %v322_v0 = vpop.f32.mrb[9].mxu0 }
 0x15d   : > { %v323_v1 = vadd.f32 %v1694_v22, %v322_v0  ;;  %1980 = vmatprep.mubr.f32.mxu1 %v367_v61 }
 0x15e   : > { %v370_v2 = vmax.f32 %v328_v63, 0.0  ;;  %1981 = vmatmul.mubr.f32.gmra.mrb[6].mxu1 %v368_v46 }
 0x15f   : > { %v369_v3 = vmax.f32 %v323_v1, 0.0  ;;  %v1932_v4 = vpop.f32.mrb[10].mxu0 }
 0x160   : > { %v338_v5 = vadd.f32 %v1932_v4, %v1694_v22  ;;  %v332_v6 = vpop.f32.mrb[11].mxu0 }
 0x161   : > { %v333_v7 = vadd.f32 %v1694_v22, %v332_v6  ;;  %1983 = vmatprep.mubr.f32.mxu1 %v369_v3 }
 0x162   : > { %v372_v8 = vmax.f32 %v338_v5, 0.0  ;;  %1984 = vmatmul.mubr.f32.gmra.mrb[8].mxu1 %v370_v2 }
 0x163   : > { %v371_v10 = vmax.f32 %v333_v7, 0.0  ;;  %v1935_v11 = vpop.f32.mrb[12].mxu0 }
 0x164   : > { %v348_v12 = vadd.f32 %v1935_v11, %v1694_v22  ;;  %v342_v13 = vpop.f32.mrb[13].mxu0 }
 0x165   : > { %v343_v14 = vadd.f32 %v1694_v22, %v342_v13  ;;  %1986 = vmatprep.mubr.f32.mxu1 %v371_v10 }
 0x166   : > { %v374_v15 = vmax.f32 %v348_v12, 0.0  ;;  %1987 = vmatmul.mubr.f32.gmra.mrb[10].mxu1 %v372_v8 }
 0x167   : > { %v373_v16 = vmax.f32 %v343_v14, 0.0  ;;  %v1938_v17 = vpop.f32.mrb[14].mxu0 }
 0x168   : > { %v358_v18 = vadd.f32 %v1938_v17, %v1694_v22  ;;  %v352_v19 = vpop.f32.mrb[15].mxu0 }
 0x169   : > { %v353_v20 = vadd.f32 %v1694_v22, %v352_v19  ;;  %1989 = vmatprep.mubr.f32.mxu1 %v373_v16 }
 0x16a   : > { %v376_v21 = vmax.f32 %v358_v18, 0.0  ;;  %1990 = vmatmul.mubr.f32.gmra.mrb[12].mxu1 %v374_v15 }
 0x16b   : > { %v375_v23 = vmax.f32 %v353_v20, 0.0 }
 0x16d   : > { %1992 = vmatprep.mubr.f32.mxu1 %v375_v23 }
 0x16e   : > { %1993 = vmatmul.mubr.f32.gmra.mrb[14].mxu1 %v376_v21 }
 0x225   : > { %v1973_v28 = vpop.f32.mrb[0].mxu1 }
 0x226   : > { %v470_v29 = vadd.f32 %v1973_v28, %v1695_v27  ;;  %v464_v30 = vpop.f32.mrb[1].mxu1 }
 0x227   : > { %v465_v31 = vadd.f32 %v1695_v27, %v464_v30 }
 0x228   : > { %v544_v34 = vmax.f32 %v470_v29, 0.0  ;;  %v2904_v29 = vld [vmem:[#allocation5 + $0x190] ss:$0 sm:$0xff] }
 0x229   : > { %v543_v32 = vmax.f32 %v465_v31, 0.0  ;;  %v1976_v33 = vpop.f32.mrb[2].mxu1 }
 0x22a   : > { %v480_v22 = vadd.f32 %v1976_v33, %v1695_v27  ;;  %v474_v35 = vpop.f32.mrb[3].mxu1 }
 0x22b   : > { %v475_v36 = vadd.f32 %v1695_v27, %v474_v35  ;;  %2027 = vmatprep.mubr.f32.mxu0 %v543_v32 }
 0x22c   : > { %v546_v37 = vmax.f32 %v480_v22, 0.0  ;;  %2028 = vmatmul.mubr.f32.vlgmr.msra.gmra.mrb[16].mxu0 %v544_v34 }
 0x22d   : > { %v545_v38 = vmax.f32 %v475_v36, 0.0  ;;  %v1979_v39 = vpop.f32.mrb[4].mxu1 }
 0x22e   : > { %v490_v40 = vadd.f32 %v1979_v39, %v1695_v27  ;;  %v484_v41 = vpop.f32.mrb[5].mxu1 }
 0x22f   : > { %v485_v42 = vadd.f32 %v1695_v27, %v484_v41  ;;  %2030 = vmatprep.mubr.f32.mxu0 %v545_v38 }
 0x230   : > { %v548_v43 = vmax.f32 %v490_v40, 0.0  ;;  %2031 = vmatmul.mubr.f32.gmra.mrb[18].mxu0 %v546_v37 }
 0x231   : > { %v547_v44 = vmax.f32 %v485_v42, 0.0  ;;  %v1982_v46 = vpop.f32.mrb[6].mxu1 }
 0x232   : > { %v500_v61 = vadd.f32 %v1982_v46, %v1695_v27  ;;  %v494_v62 = vpop.f32.mrb[7].mxu1 }
 0x233   : > { %v495_v63 = vadd.f32 %v1695_v27, %v494_v62  ;;  %2033 = vmatprep.mubr.f32.mxu0 %v547_v44  ;;  %v2659_v44 = vmov 32  }
 0x234   : > { %v550_v0 = vmax.f32 %v500_v61, 0.0  ;;  %2034 = vmatmul.mubr.f32.gmra.mrb[20].mxu0 %v548_v43  ;;  %v2658_v43 = vmov 33   ;;  %2403 = vset.pattern.permute.xlu1 %v2659_v44 }
 0x235   : > { %v549_v1 = vmax.f32 %v495_v63, 0.0  ;;  %v1985_v2 = vpop.f32.mrb[8].mxu1  ;;  %2404 = vset.pattern.permute.xlu0 %v2658_v43 }
 0x236   : > { %v510_v3 = vadd.f32 %v1985_v2, %v1695_v27  ;;  %v504_v4 = vpop.f32.mrb[9].mxu1 }
 0x237   : > { %v505_v5 = vadd.f32 %v1695_v27, %v504_v4  ;;  %2036 = vmatprep.mubr.f32.mxu0 %v549_v1 }
 0x238   : > { %v552_v6 = vmax.f32 %v510_v3, 0.0  ;;  %2037 = vmatmul.mubr.f32.gmra.mrb[22].mxu0 %v550_v0 }
 0x239   : > { %v551_v7 = vmax.f32 %v505_v5, 0.0  ;;  %v1988_v8 = vpop.f32.mrb[10].mxu1 }
 0x23a   : > { %v520_v10 = vadd.f32 %v1988_v8, %v1695_v27  ;;  %v514_v11 = vpop.f32.mrb[11].mxu1 }
 0x23b   : > { %v515_v12 = vadd.f32 %v1695_v27, %v514_v11  ;;  %2039 = vmatprep.mubr.f32.mxu0 %v551_v7 }
 0x23c   : > { %v554_v13 = vmax.f32 %v520_v10, 0.0  ;;  %2040 = vmatmul.mubr.f32.gmra.mrb[24].mxu0 %v552_v6 }
 0x23d   : > { %v553_v14 = vmax.f32 %v515_v12, 0.0  ;;  %v1991_v15 = vpop.f32.mrb[12].mxu1 }
 0x23e   : > { %v530_v16 = vadd.f32 %v1991_v15, %v1695_v27  ;;  %v524_v17 = vpop.f32.mrb[13].mxu1 }
 0x23f   : > { %v525_v18 = vadd.f32 %v1695_v27, %v524_v17  ;;  %2042 = vmatprep.mubr.f32.mxu0 %v553_v14 }
 0x240   : > { %v556_v19 = vmax.f32 %v530_v16, 0.0  ;;  %2043 = vmatmul.mubr.f32.gmra.mrb[26].mxu0 %v554_v13 }
 0x241   : > { %v555_v20 = vmax.f32 %v525_v18, 0.0  ;;  %v1994_v21 = vpop.f32.mrb[14].mxu1 }
 0x242   : > { %v540_v23 = vadd.f32 %v1994_v21, %v1695_v27  ;;  %v534_v24 = vpop.f32.mrb[15].mxu1 }
 0x243   : > { %v535_v25 = vadd.f32 %v1695_v27, %v534_v24  ;;  %2045 = vmatprep.mubr.f32.mxu0 %v555_v20 }
 0x244   : > { %v558_v26 = vmax.f32 %v540_v23, 0.0  ;;  %2046 = vmatmul.mubr.f32.gmra.mrb[28].mxu0 %v556_v19 }
 0x245   : > { %v557_v28 = vmax.f32 %v535_v25, 0.0 }
 0x247   : > { %2048 = vmatprep.mubr.f32.mxu0 %v557_v28 }
 0x248   : > { %2049 = vmatmul.mubr.f32.gmra.mrb[30].mxu0 %v558_v26 }
 0x2ff   : > { %v2029_v30 = vpop.f32.mrb[16].mxu0 }
 0x300   : > { %v2907_v31 = vadd.f32 %v2029_v30, %v2904_v29  ;;  %v646_v32 = vpop.f32.mrb[17].mxu0 }
 0x301   : > { %v2910_v33 = vadd.f32 %v2904_v29, %v646_v32 }
 0x302   : > { %v726_v34 = vmul.f32 0.5, %v2907_v31 }
 0x303   : > { %v725_v27 = vmul.f32 0.5, %v2910_v33  ;;  %v2032_v22 = vpop.f32.mrb[18].mxu0 }
 0x304   : > { %v743_v35 = vmul.f32 1.442695, %v726_v34  ;;  %v2915_v36 = vadd.f32 %v2032_v22, %v2904_v29  ;;  %v656_v37 = vpop.f32.mrb[19].mxu0 }
 0x305   : > { %v741_v38 = vmul.f32 1.442695, %v725_v27  ;;  %v2918_v39 = vadd.f32 %v2904_v29, %v656_v37 }
 0x306   : > { %2428 = vpow2.f32 %v743_v35  ;;  %v728_v40 = vmul.f32 0.5, %v2915_v36 }
 0x307   : > { %v727_v41 = vmul.f32 0.5, %v2918_v39  ;;  %v2035_v42 = vpop.f32.mrb[20].mxu0  ;;  %2430 = vpow2.f32 %v741_v38 }
 0x308   : > { %v747_v46 = vmul.f32 1.442695, %v728_v40  ;;  %v2925_v61 = vadd.f32 %v2035_v42, %v2904_v29  ;;  %v666_v62 = vpop.f32.mrb[21].mxu0 }
 0x309   : > { %v2928_v63 = vadd.f32 %v2904_v29, %v666_v62  ;;  %v745_v0 = vmul.f32 1.442695, %v727_v41 }
 0x30a   : > { %2432 = vpow2.f32 %v747_v46  ;;  %v730_v1 = vmul.f32 0.5, %v2925_v61 }
 0x30b   : > { %v729_v2 = vmul.f32 0.5, %v2928_v63  ;;  %v2038_v3 = vpop.f32.mrb[22].mxu0  ;;  %2434 = vpow2.f32 %v745_v0 }
 0x30c   : > { %v751_v4 = vmul.f32 1.442695, %v730_v1  ;;  %v2933_v5 = vadd.f32 %v2038_v3, %v2904_v29  ;;  %v676_v6 = vpop.f32.mrb[23].mxu0 }
 0x30d   : > { %v749_v7 = vmul.f32 1.442695, %v729_v2  ;;  %v2936_v8 = vadd.f32 %v2904_v29, %v676_v6 }
 0x30e   : > { %v732_v10 = vmul.f32 0.5, %v2933_v5 }
 0x30f   : > { %2436 = vpow2.f32 %v749_v7  ;;  %v731_v11 = vmul.f32 0.5, %v2936_v8  ;;  %v2041_v12 = vpop.f32.mrb[24].mxu0 }
 0x310   : > { %v2429_v13 = vpop.eup %2428  ;;  %2438 = vpow2.f32 %v751_v4  ;;  %v755_v14 = vmul.f32 1.442695, %v732_v10  ;;  %v2941_v15 = vadd.f32 %v2041_v12, %v2904_v29  ;;  %v686_v16 = vpop.f32.mrb[25].mxu0 }
 0x311   : > { %v753_v17 = vmul.f32 1.442695, %v731_v11  ;;  %v2944_v18 = vadd.f32 %v2904_v29, %v686_v16  ;;  %791 = vrot.lane.b32.xlu0 %v2429_v13, %s2660_s15  ;;  %v2431_v20 = vpop.eup %2430 }
 0x312   : > { %v734_v19 = vmul.f32 0.5, %v2941_v15 }
 0x313   : > { %2440 = vpow2.f32 %v753_v17  ;;  %v733_v21 = vmul.f32 0.5, %v2944_v18  ;;  %v2044_v23 = vpop.f32.mrb[26].mxu0 }
 0x314   : > { %v2433_v24 = vpop.eup %2432  ;;  %2442 = vpow2.f32 %v755_v14  ;;  %v759_v25 = vmul.f32 1.442695, %v734_v19  ;;  %v2950_v26 = vadd.f32 %v2044_v23, %v2904_v29  ;;  %v696_v28 = vpop.f32.mrb[27].mxu0 }
 0x315   : > { %v757_v30 = vmul.f32 1.442695, %v733_v21  ;;  %v2953_v32 = vadd.f32 %v2904_v29, %v696_v28  ;;  %795 = vrot.lane.b32.xlu1 %v2433_v24, %s2660_s15  ;;  %789 = vrot.lane.b32.xlu0 %v2431_v20, %s2660_s15  ;;  %v2435_v35 = vpop.eup %2434 }
 0x316   : > { %v736_v34 = vmul.f32 0.5, %v2950_v26 }
 0x317   : > { %2444 = vpow2.f32 %v757_v30  ;;  %v735_v27 = vmul.f32 0.5, %v2953_v32  ;;  %v2047_v22 = vpop.f32.mrb[28].mxu0  ;;  %v1107_v30 = vld [vmem:[#allocation5 + $0x220] sm:$0xff] }
 0x318   : > { %2446 = vpow2.f32 %v759_v25  ;;  %v763_v37 = vmul.f32 1.442695, %v736_v34  ;;  %v2960_v38 = vadd.f32 %v2047_v22, %v2904_v29  ;;  %v706_v40 = vpop.f32.mrb[29].mxu0  ;;  %v1108_v34 = vld [vmem:[#allocation5 + $0x228] sm:$0xff] }
 0x319   : > { %v2437_v41 = vpop.eup %2436  ;;  %v761_v42 = vmul.f32 1.442695, %v735_v27  ;;  %v2963_v46 = vadd.f32 %v2904_v29, %v706_v40  ;;  %793 = vrot.lane.b32.xlu1 %v2435_v35, %s2660_s15  ;;  %v1109_v27 = vld [vmem:[#allocation5 + $0x230] sm:$0xff]  ;;  %v2259_v22 = vpack.c.bf16 %v1108_v34, %v1107_v30  ;;  %v1110_v35 = vld [vmem:[#allocation5 + $0x238] sm:$0xff]  ;;  %v1111_v40 = vld [vmem:[#allocation5 + $0x240] sm:$0xff] }
 0x31a   : > { %v2439_v62 = vpop.eup %2438  ;;  %v738_v0 = vmul.f32 0.5, %v2960_v38  ;;  %797 = vrot.lane.b32.xlu0 %v2437_v41, %s2660_s15  ;;  %v1112_v41 = vld [vmem:[#allocation5 + $0x248] sm:$0xff]  ;;  %v1121_v34 = vld [vmem:[#allocation5 + $0x290] sm:$0xff] }
 0x31b   : > { %2448 = vpow2.f32 %v761_v42  ;;  %v737_v1 = vmul.f32 0.5, %v2963_v46  ;;  %v2050_v2 = vpop.f32.mrb[30].mxu0  ;;  %2260 = vmatprep.subr.bf16.mxu1 %v2259_v22  ;;  %v2267_v42 = vpack.c.bf16 %v1112_v41, %v1111_v40 }
 0x31c   : > { %2450 = vpow2.f32 %v763_v37  ;;  %v767_v3 = vmul.f32 1.442695, %v738_v0  ;;  %v2970_v4 = vadd.f32 %v2050_v2, %v2904_v29  ;;  %v716_v6 = vpop.f32.mrb[31].mxu0  ;;  %v2263_v37 = vpack.c.bf16 %v1110_v35, %v1109_v27  ;;  %2262 = vmatpush3.bf16.msra.mxu1 %v2259_v22  ;;  %v1114_v0 = vld [vmem:[#allocation5 + $0x258] sm:$0xff]  ;;  %v1115_v2 = vld [vmem:[#allocation5 + $0x260] sm:$0xff] }
 0x31d   : > { %v2441_v7 = vpop.eup %2440  ;;  %v765_v10 = vmul.f32 1.442695, %v737_v1  ;;  %v2973_v11 = vadd.f32 %v2904_v29, %v716_v6  ;;  %799 = vrot.lane.b32.xlu1 %v2439_v62, %s2660_s15  ;;  %v1113_v62 = vld [vmem:[#allocation5 + $0x250] sm:$0xff]  ;;  %v1122_v27 = vld [vmem:[#allocation5 + $0x298] sm:$0xff] }
 0x31e   : > { %v2443_v12 = vpop.eup %2442  ;;  %v740_v13 = vmul.f32 0.5, %v2970_v4  ;;  %801 = vrot.lane.b32.xlu0 %v2441_v7, %s2660_s15  ;;  %2264 = vmatprep.subr.bf16.mxu1 %v2263_v37  ;;  %v2271_v1 = vpack.c.bf16 %v1114_v0, %v1113_v62  ;;  %v2287_v35 = vpack.c.bf16 %v1122_v27, %v1121_v34  ;;  %v1294_v34 = vld [vmem:[#allocation5 + $0x2d0] sm:$0xff]  ;;  %v1295_v27 = vld [vmem:[#allocation5 + $0x2d8] sm:$0xff] }
 0x31f   : > { %2452 = vpow2.f32 %v765_v10  ;;  %v739_v14 = vmul.f32 0.5, %v2973_v11 }
 0x320   : > { %2454 = vpow2.f32 %v767_v3  ;;  %v771_v16 = vmul.f32 1.442695, %v740_v13  ;;  %2266 = vmatpush3.bf16.msra.mxu1 %v2263_v37  ;;  %v1116_v3 = vld [vmem:[#allocation5 + $0x268] sm:$0xff] }
 0x321   : > { %v2445_v17 = vpop.eup %2444  ;;  %v769_v19 = vmul.f32 1.442695, %v739_v14  ;;  %803 = vrot.lane.b32.xlu1 %v2443_v12, %s2660_s15  ;;  %2268 = vmatprep.subr.bf16.mxu1 %v2267_v42  ;;  %v2275_v6 = vpack.c.bf16 %v1116_v3, %v1115_v2 }
 0x322   : > { %v2447_v20 = vpop.eup %2446  ;;  %805 = vrot.lane.b32.xlu0 %v2445_v17, %s2660_s15  ;;  %v1118_v17 = vld [vmem:[#allocation5 + $0x278] sm:$0xff] }
 0x323   : > { %2456 = vpow2.f32 %v769_v19 }
 0x324   : > { %2458 = vpow2.f32 %v771_v16  ;;  %2270 = vmatpush3.bf16.msra.mxu1 %v2267_v42  ;;  %v1117_v16 = vld [vmem:[#allocation5 + $0x270] sm:$0xff] }
 0x325   : > { %v2449_v29 = vpop.eup %2448  ;;  %807 = vrot.lane.b32.xlu1 %v2447_v20, %s2660_s15  ;;  %2272 = vmatprep.subr.bf16.mxu1 %v2271_v1  ;;  %v2279_v20 = vpack.c.bf16 %v1118_v17, %v1117_v16 }
 0x326   : > { %v2451_v21 = vpop.eup %2450  ;;  %809 = vrot.lane.b32.xlu0 %v2449_v29, %s2660_s15 }
 0x328   : > { %2274 = vmatpush3.bf16.msra.mxu1 %v2271_v1 }
 0x329   : > { %v2453_v23 = vpop.eup %2452  ;;  %811 = vrot.lane.b32.xlu1 %v2451_v21, %s2660_s15  ;;  %2276 = vmatprep.subr.bf16.mxu1 %v2275_v6 }
 0x32a   : > { %v2455_v24 = vpop.eup %2454  ;;  %813 = vrot.lane.b32.xlu0 %v2453_v23, %s2660_s15 }
 0x32c   : > { %2278 = vmatpush3.bf16.msra.mxu1 %v2275_v6 }
 0x32d   : > { %v2457_v25 = vpop.eup %2456  ;;  %815 = vrot.lane.b32.xlu1 %v2455_v24, %s2660_s15  ;;  %2280 = vmatprep.subr.bf16.mxu1 %v2279_v20  ;;  %v1119_v24 = vld [vmem:[#allocation5 + $0x280] sm:$0xff] }
 0x32e   : > { %v2459_v28 = vpop.eup %2458  ;;  %817 = vrot.lane.b32.xlu0 %v2457_v25, %s2660_s15 }
 0x330   : > { %2282 = vmatpush3.bf16.msra.mxu1 %v2279_v20 }
 0x331   : > { %819 = vrot.lane.b32.xlu1 %v2459_v28, %s2660_s15 }
 0x383   : > { %v792_v7 = vpop.permute.xlu0 %791 }
 0x384   : > { %v838_v10 = vmul.f32 %v792_v7, %v2845_v45  ;;  %v1120_v45 = vld [vmem:[#allocation5 + $0x288] sm:$0xff] }
 0x385   : > { %v2283_v28 = vpack.c.bf16 %v1120_v45, %v1119_v24  ;;  %v1289_v24 = vld [vmem:[#allocation5 + $0x2a8] sm:$0xff]  ;;  %v1290_v45 = vld [vmem:[#allocation5 + $0x2b0] sm:$0xff] }
 0x386   : > { %v854_v12 = vadd.f32 %v838_v10, %v2907_v31 }
 0x387   : > { %v796_v13 = vpop.permute.xlu1 %795  ;;  %v790_v14 = vpop.permute.xlu0 %789  ;;  %2284 = vmatprep.subr.bf16.mxu1 %v2283_v28 }
 0x388   : > { %v837_v19 = vmul.f32 %v790_v14, %v2841_v9  ;;  %877 = vperm.xlu1 %2403, %v854_v12   ;;  %975 = vperm.xlu0 %2404, %v854_v12   ;;  %v840_v21 = vmul.f32 %v796_v13, %v2853_v48 }
 0x389   : > { %2286 = vmatpush3.bf16.msra.mxu1 %v2283_v28  ;;  %v2291_v28 = vpack.c.bf16 %v1290_v45, %v1289_v24 }
 0x38a   : > { %v853_v29 = vadd.f32 %v837_v19, %v2910_v33  ;;  %v856_v9 = vadd.f32 %v840_v21, %v2915_v36  ;;  %2288 = vmatprep.subr.bf16.mxu1 %v2287_v35 }
 0x38b   : > { %v794_v23 = vpop.permute.xlu1 %793  ;;  %2292 = vmatprep.subr.bf16.mxu0 %v2291_v28 }
 0x38c   : > { %2406 = vset.pattern.permute.xlu1 %v2658_v43  ;;  %2405 = vset.pattern.permute.xlu0 %v2659_v44  ;;  %v798_v25 = vpop.permute.xlu0 %797  ;;  %v839_v48 = vmul.f32 %v794_v23, %v2848_v47 }
 0x38d   : > { %971 = vperm.xlu1 %2406, %v853_v29   ;;  %872 = vperm.xlu0 %2405, %v853_v29   ;;  %v841_v22 = vmul.f32 %v798_v25, %v2856_v49  ;;  %v1291_v25 = vld [vmem:[#allocation5 + $0x2b8] sm:$0xff] }
 0x38e   : > { %2290 = vmatpush3.bf16.msra.mxu1 %v2287_v35  ;;  %v855_v41 = vadd.f32 %v839_v48, %v2918_v39  ;;  %2294 = vmatpush3.bf16.msra.mxu0 %v2291_v28  ;;  %v950_v48 = vlaneseq  ;;  %v1297_v35 = vld [vmem:[#allocation5 + $0x2e8] sm:$0xff] }
 0x38f   : > { %v800_v30 = vpop.permute.xlu1 %799  ;;  %v857_v42 = vadd.f32 %v841_v22, %v2928_v63  ;;  %2323 = vmatprep.subr.bf16.mxu1 %v2291_v28 }
 0x390   : > { %v802_v37 = vpop.permute.xlu0 %801  ;;  %v842_v1 = vmul.f32 %v800_v30, %v2861_v50 }
 0x391   : > { %983 = vperm.xlu1 %2406, %v856_v9   ;;  %887 = vperm.xlu0 %2405, %v856_v9   ;;  %v843_v0 = vmul.f32 %v802_v37, %v2864_v51  ;;  %v1292_v9 = vld [vmem:[#allocation5 + $0x2c0] sm:$0xff]  ;;  %v1298_v37 = vld [vmem:[#allocation5 + $0x2f0] sm:$0xff] }
 0x392   : > { %v858_v6 = vadd.f32 %v842_v1, %v2925_v61  ;;  %v3043_v30 = vpack.c.bf16 %v1292_v9, %v1291_v25  ;;  %v869_v1 = vld [vmem:[#allocation5 + $0x198] sm:$0x3] }
 0x393   : > { %v804_v40 = vpop.permute.xlu1 %803 }
 0x394   : > { %v844_v62 = vmul.f32 %v804_v40, %v2869_v52  ;;  %v806_v49 = vpop.permute.xlu0 %805  ;;  %v859_v52 = vadd.f32 %v843_v0, %v2936_v8  ;;  %2296 = vmatprep.subr.bf16.mxu0 %v3043_v30  ;;  %v951_v40 = vshrl.u32 %v950_v48, 7 }
 0x395   : > { %2407 = vset.pattern.permute.xlu1 %v2659_v44  ;;  %2412 = vset.pattern.permute.xlu0 %v2658_v43  ;;  %v845_v29 = vmul.f32 %v806_v49, %v2872_v53 }
 0x396   : > { %882 = vperm.xlu1 %2407, %v855_v41   ;;  %987 = vperm.xlu0 %2412, %v857_v42   ;;  %v860_v47 = vadd.f32 %v844_v62, %v2933_v5  ;;  %v1300_v62 = vld [vmem:[#allocation5 + $0x300] sm:$0xff]  ;;  %v1036_v49 = vsub.s32 1, %v951_v40 }
 0x397   : > { %v808_v2 = vpop.permute.xlu1 %807  ;;  %2298 = vmatpush3.bf16.msra.mxu0 %v3043_v30 }
 0x398   : > { %v846_v3 = vmul.f32 %v808_v2, %v2877_v54  ;;  %v810_v7 = vpop.permute.xlu0 %809  ;;  %v1301_v2 = vld [vmem:[#allocation5 + $0x308] sm:$0xff] }
 0x399   : > { %v847_v51 = vmul.f32 %v810_v7, %v2880_v55 }
 0x39a   : > { %2408 = vset.pattern.permute.xlu1 %v2658_v43  ;;  %999 = vperm.xlu0 %2412, %v860_v47   ;;  %v862_v50 = vadd.f32 %v846_v3, %v2941_v15 }
 0x39b   : > { %979 = vperm.xlu1 %2408, %v855_v41   ;;  %v812_v10 = vpop.permute.xlu1 %811  ;;  %v863_v54 = vadd.f32 %v847_v51, %v2953_v32  ;;  %v3055_v41 = vpack.c.bf16 %v1298_v37, %v1297_v35 }
 0x39c   : > { %v814_v12 = vpop.permute.xlu0 %813 }
 0x39d   : > { %v849_v13 = vmul.f32 %v814_v12, %v2888_v57 }
 0x39e   : > { %2413 = vset.pattern.permute.xlu0 %v2659_v44 }
 0x39f   : > { %2409 = vset.pattern.permute.xlu1 %v2659_v44  ;;  %902 = vperm.xlu0 %2413, %v859_v52   ;;  %v816_v14 = vpop.permute.xlu1 %815  ;;  %v865_v16 = vadd.f32 %v849_v13, %v2963_v46 }
 0x3a0   : > { %897 = vperm.xlu1 %2409, %v858_v6   ;;  %v850_v55 = vmul.f32 %v816_v14, %v2893_v58  ;;  %v861_v58 = vadd.f32 %v845_v29, %v2944_v18  ;;  %v818_v53 = vpop.permute.xlu0 %817 }
 0x3a1   : > { %v851_v23 = vmul.f32 %v818_v53, %v2896_v59  ;;  %v1293_v59 = vld [vmem:[#allocation5 + $0x2c8] sm:$0xff] }
 0x3a2   : > { %v866_v19 = vadd.f32 %v850_v55, %v2960_v38 }
 0x3a3   : > { %917 = vperm.xlu0 %2413, %v862_v50   ;;  %v820_v17 = vpop.permute.xlu1 %819 }
 0x3a4   : > { %2410 = vset.pattern.permute.xlu1 %v2658_v43  ;;  %v852_v57 = vmul.f32 %v820_v17, %v2901_v60  ;;  %v848_v60 = vmul.f32 %v812_v10, %v2885_v56  ;;  %v867_v56 = vadd.f32 %v851_v23, %v2973_v11 }
 0x3a5   : > { %991 = vperm.xlu1 %2410, %v858_v6   ;;  %v3064_v6 = vrot.slane %v869_v1, %v1036_v49 }
 0x3a6   : > { %v868_v20 = vadd.f32 %v852_v57, %v2970_v4  ;;  %v864_v21 = vadd.f32 %v848_v60, %v2950_v26 }
 0x3a7   : > { %2420 = vset.pattern.permute.xlu0 %v2658_v43 }
 0x3a8   : > { %1011 = vperm.xlu0 %2420, %v863_v54  }
 0x3a9   : > { %2411 = vset.pattern.permute.xlu1 %v2659_v44 }
 0x3aa   : > { %892 = vperm.xlu1 %2411, %v857_v42   ;;  %v1299_v42 = vld [vmem:[#allocation5 + $0x2f8] sm:$0xff] }
 0x3ab   : > { %v3059_v0 = vpack.c.bf16 %v1300_v62, %v1299_v42 }
 0x3ac   : > { %2421 = vset.pattern.permute.xlu0 %v2659_v44 }
 0x3ad   : > { %932 = vperm.xlu0 %2421, %v865_v16  }
 0x3ae   : > { %907 = vperm.xlu1 %2411, %v860_v47   ;;  %v952_v47 = vsub.s32 0, %v951_v40 }
 0x3b0   : > { %v3062_v3 = vrot.slane %v869_v1, %v952_v47 }
 0x3b1   : > { %2422 = vset.pattern.permute.xlu0 %v2658_v43 }
 0x3b2   : > { %2414 = vset.pattern.permute.xlu1 %v2658_v43  ;;  %1023 = vperm.xlu0 %2422, %v866_v19  }
 0x3b3   : > { %995 = vperm.xlu1 %2414, %v859_v52   ;;  %v1302_v52 = vld [vmem:[#allocation5 + $0x310] sm:$0xff] }
 0x3b4   : > { %v3067_v7 = vpack.c.bf16 %v1302_v52, %v1301_v2 }
 0x3b6   : > { %2426 = vset.pattern.permute.xlu0 %v2659_v44 }
 0x3b7   : > { %1007 = vperm.xlu1 %2414, %v862_v50   ;;  %947 = vperm.xlu0 %2426, %v868_v20  }
 0x3bb   : > { %2415 = vset.pattern.permute.xlu1 %v2659_v44  ;;  %2427 = vset.pattern.permute.xlu0 %v2658_v43 }
 0x3bc   : > { %912 = vperm.xlu1 %2415, %v861_v58  }
 0x3c0   : > { %2416 = vset.pattern.permute.xlu1 %v2658_v43 }
 0x3c1   : > { %1003 = vperm.xlu1 %2416, %v861_v58  }
 0x3c5   : > { %2417 = vset.pattern.permute.xlu1 %v2659_v44 }
 0x3c6   : > { %927 = vperm.xlu1 %2417, %v864_v21  }
 0x3ca   : > { %2418 = vset.pattern.permute.xlu1 %v2658_v43 }
 0x3cb   : > { %1015 = vperm.xlu1 %2418, %v864_v21  }
 0x3cf   : > { %2419 = vset.pattern.permute.xlu1 %v2659_v44 }
 0x3d0   : > { %922 = vperm.xlu1 %2419, %v863_v54  }
 0x3d4   : > { %937 = vperm.xlu1 %2419, %v866_v19  }
 0x3d8   : > { %2423 = vset.pattern.permute.xlu1 %v2658_v43 }
 0x3d9   : > { %1019 = vperm.xlu1 %2423, %v865_v16   ;;  %v3074_v16 = vld [vmem:[#allocation5 + $0x218] ss:$0 sm:$0xff] }
 0x3dd   : > { %2424 = vset.pattern.permute.xlu1 %v2659_v44  ;;  %v3046_v44 = vpack.c.bf16 %v1294_v34, %v1293_v59 }
 0x3de   : > { %942 = vperm.xlu1 %2424, %v867_v56  }
 0x3df   : > { %2300 = vmatprep.subr.bf16.mxu0 %v3046_v44 }
 0x3e0   : > { %2302 = vmatpush3.bf16.msra.mxu0 %v3046_v44 }
 0x3e2   : > { %2425 = vset.pattern.permute.xlu1 %v2658_v43  ;;  %v1296_v43 = vld [vmem:[#allocation5 + $0x2e0] sm:$0xff] }
 0x3e3   : > { %1027 = vperm.xlu1 %2425, %v867_v56   ;;  %v3050_v22 = vpack.c.bf16 %v1296_v43, %v1295_v27 }
 0x3e5   : > { %2304 = vmatprep.subr.bf16.mxu0 %v3050_v22 }
 0x3e6   : > { %2306 = vmatpush3.bf16.msra.mxu0 %v3050_v22 }
 0x3e7   : > { %1031 = vperm.xlu1 %2425, %v868_v20   ;;  %2308 = vmatprep.subr.bf16.mxu0 %v3055_v41 }
 0x3ea   : > { %2310 = vmatpush3.bf16.msra.mxu0 %v3055_v41 }
 0x3eb   : > { %2312 = vmatprep.subr.bf16.mxu0 %v3059_v0 }
 0x3ee   : > { %2314 = vmatpush3.bf16.msra.mxu0 %v3059_v0 }
 0x3ef   : > { %2316 = vmatprep.subr.bf16.mxu0 %v3067_v7 }
 0x3f2   : > { %2318 = vmatpush3.bf16.msra.mxu0 %v3067_v7 }
 0x407   : > { %v878_v50 = vpop.permute.xlu1 %877  ;;  %v976_v51 = vpop.permute.xlu0 %975 }
 0x408   : > { %v955_v10 = vmul.f32 %v3062_v3, %v878_v50  ;;  %v1039_v12 = vmul.f32 %v3064_v6, %v976_v51 }
 0x40a   : > { %v1055_v54 = vadd.f32 %v1039_v12, %v955_v10 }
 0x40c   : > { %v972_v13 = vpop.permute.xlu1 %971  ;;  %v873_v14 = vpop.permute.xlu0 %872  ;;  %v1076_v57 = vadd.f32 %v3074_v16, %v1055_v54 }
 0x40d   : > { %v1038_v55 = vmul.f32 %v3064_v6, %v972_v13  ;;  %v954_v17 = vmul.f32 %v3062_v3, %v873_v14 }
 0x40e   : > { %v1092_v21 = vmax.f32 %v1076_v57, 0.0 }
 0x40f   : > { %v1054_v19 = vadd.f32 %v1038_v55, %v954_v17 }
 0x410   : > { %v984_v20 = vpop.permute.xlu1 %983  ;;  %v888_v58 = vpop.permute.xlu0 %887 }
 0x411   : > { %v1075_v29 = vadd.f32 %v3074_v16, %v1054_v19  ;;  %v1041_v23 = vmul.f32 %v3064_v6, %v984_v20  ;;  %v957_v56 = vmul.f32 %v3062_v3, %v888_v58 }
 0x413   : > { %v1091_v60 = vmax.f32 %v1075_v29, 0.0  ;;  %v1057_v24 = vadd.f32 %v1041_v23, %v957_v56 }
 0x415   : > { %v883_v53 = vpop.permute.xlu1 %882  ;;  %2083 = vmatprep.mubr.f32.mxu1 %v1091_v60  ;;  %v1078_v34 = vadd.f32 %v3074_v16, %v1057_v24  ;;  %v988_v37 = vpop.permute.xlu0 %987 }
 0x416   : > { %2084 = vmatmul.mubr.f32.vlgmr.msra.gmra.mrb[16].mxu1 %v1092_v21  ;;  %v956_v25 = vmul.f32 %v3062_v3, %v883_v53  ;;  %v1042_v47 = vmul.f32 %v3064_v6, %v988_v37 }
 0x417   : > { %2331 = vmatpush3.bf16.msra.mxu1 %v2291_v28  ;;  %v1094_v35 = vmax.f32 %v1078_v34, 0.0 }
 0x418   : > { %2324 = vmatprep.subr.bf16.mxu1 %v3043_v30 }
 0x419   : > { %v1000_v49 = vpop.permute.xlu0 %999 }
 0x41a   : > { %v980_v45 = vpop.permute.xlu1 %979  ;;  %v1045_v51 = vmul.f32 %v3064_v6, %v1000_v49 }
 0x41b   : > { %v1040_v9 = vmul.f32 %v3064_v6, %v980_v45  ;;  %2332 = vmatpush3.bf16.msra.mxu1 %v3043_v30 }
 0x41c   : > { %2325 = vmatprep.subr.bf16.mxu1 %v3046_v44 }
 0x41d   : > { %v1056_v59 = vadd.f32 %v1040_v9, %v956_v25 }
 0x41e   : > { %v903_v10 = vpop.permute.xlu0 %902 }
 0x41f   : > { %v898_v27 = vpop.permute.xlu1 %897  ;;  %v1077_v43 = vadd.f32 %v3074_v16, %v1056_v59  ;;  %2333 = vmatpush3.bf16.msra.mxu1 %v3046_v44 }
 0x420   : > { %2326 = vmatprep.subr.bf16.mxu1 %v3050_v22  ;;  %v959_v42 = vmul.f32 %v3062_v3, %v898_v27 }
 0x421   : > { %v1093_v28 = vmax.f32 %v1077_v43, 0.0 }
 0x422   : > { %v918_v58 = vpop.permute.xlu0 %917 }
 0x423   : > { %2086 = vmatprep.mubr.f32.mxu1 %v1093_v28  ;;  %2334 = vmatpush3.bf16.msra.mxu1 %v3050_v22  ;;  %v963_v53 = vmul.f32 %v3062_v3, %v918_v58 }
 0x424   : > { %v992_v40 = vpop.permute.xlu1 %991  ;;  %2087 = vmatmul.mubr.f32.gmra.mrb[18].mxu1 %v1094_v35  ;;  %2327 = vmatprep.subr.bf16.mxu1 %v3055_v41 }
 0x425   : > { %v1043_v30 = vmul.f32 %v3064_v6, %v992_v40 }
 0x427   : > { %2335 = vmatpush3.bf16.msra.mxu1 %v3055_v41  ;;  %v1059_v44 = vadd.f32 %v1043_v30, %v959_v42  ;;  %v1012_v27 = vpop.permute.xlu0 %1011 }
 0x428   : > { %2328 = vmatprep.subr.bf16.mxu1 %v3059_v0 }
 0x429   : > { %v893_v62 = vpop.permute.xlu1 %892  ;;  %v1080_v52 = vadd.f32 %v3074_v16, %v1059_v44 }
 0x42a   : > { %v958_v22 = vmul.f32 %v3062_v3, %v893_v62  ;;  %v1048_v62 = vmul.f32 %v3064_v6, %v1012_v27 }
 0x42b   : > { %2336 = vmatpush3.bf16.msra.mxu1 %v3059_v0  ;;  %v1096_v54 = vmax.f32 %v1080_v52, 0.0  ;;  %v960_v0 = vmul.f32 %v3062_v3, %v903_v10 }
 0x42c   : > { %v1058_v1 = vadd.f32 %v1042_v47, %v958_v22  ;;  %2329 = vmatprep.subr.bf16.mxu1 %v3067_v7  ;;  %v933_v40 = vpop.permute.xlu0 %932 }
 0x42d   : > { %v908_v2 = vpop.permute.xlu1 %907 }
 0x42e   : > { %v961_v50 = vmul.f32 %v3062_v3, %v908_v2  ;;  %v1079_v41 = vadd.f32 %v3074_v16, %v1058_v1 }
 0x42f   : > { %2337 = vmatpush3.bf16.msra.mxu1 %v3067_v7 }
 0x430   : > { %v1095_v12 = vmax.f32 %v1079_v41, 0.0  ;;  %v1061_v13 = vadd.f32 %v1045_v51, %v961_v50 }
 0x431   : > { %v1024_v22 = vpop.permute.xlu0 %1023 }
 0x432   : > { %v996_v14 = vpop.permute.xlu1 %995  ;;  %2089 = vmatprep.mubr.f32.mxu1 %v1095_v12  ;;  %v1082_v57 = vadd.f32 %v3074_v16, %v1061_v13  ;;  %v1051_v41 = vmul.f32 %v3064_v6, %v1024_v22  ;;  %v966_v13 = vmul.f32 %v3062_v3, %v933_v40 }
 0x433   : > { %v1044_v55 = vmul.f32 %v3064_v6, %v996_v14  ;;  %2090 = vmatmul.mubr.f32.gmra.mrb[20].mxu1 %v1096_v54 }
 0x434   : > { %v1098_v29 = vmax.f32 %v1082_v57, 0.0 }
 0x435   : > { %v1060_v17 = vadd.f32 %v1044_v55, %v960_v0 }
 0x436   : > { %v1008_v19 = vpop.permute.xlu1 %1007 }
 0x437   : > { %v1081_v20 = vadd.f32 %v3074_v16, %v1060_v17  ;;  %v1047_v21 = vmul.f32 %v3064_v6, %v1008_v19 }
 0x439   : > { %v1097_v7 = vmax.f32 %v1081_v20, 0.0  ;;  %v1063_v23 = vadd.f32 %v1047_v21, %v963_v53 }
 0x43b   : > { %v913_v60 = vpop.permute.xlu1 %912  ;;  %2092 = vmatprep.mubr.f32.mxu1 %v1097_v7  ;;  %v1084_v9 = vadd.f32 %v3074_v16, %v1063_v23 }
 0x43c   : > { %2093 = vmatmul.mubr.f32.gmra.mrb[22].mxu1 %v1098_v29  ;;  %v962_v24 = vmul.f32 %v3062_v3, %v913_v60  ;;  %v948_v60 = vpop.permute.xlu0 %947 }
 0x43d   : > { %v1100_v28 = vmax.f32 %v1084_v9, 0.0  ;;  %v969_v23 = vmul.f32 %v3062_v3, %v948_v60  ;;  %v1303_v9 = vld [vmem:[#allocation5 + $0x318] sm:$0xff] }
 0x440   : > { %v1004_v56 = vpop.permute.xlu1 %1003 }
 0x441   : > { %v1046_v45 = vmul.f32 %v3064_v6, %v1004_v56 }
 0x443   : > { %v1062_v25 = vadd.f32 %v1046_v45, %v962_v24 }
 0x445   : > { %v928_v59 = vpop.permute.xlu1 %927  ;;  %v1083_v34 = vadd.f32 %v3074_v16, %v1062_v25 }
 0x446   : > { %v965_v30 = vmul.f32 %v3062_v3, %v928_v59  ;;  %v1304_v59 = vld [vmem:[#allocation5 + $0x320] sm:$0xff] }
 0x447   : > { %v1099_v43 = vmax.f32 %v1083_v34, 0.0  ;;  %v2319_v34 = vpack.c.bf16 %v1304_v59, %v1303_v9 }
 0x449   : > { %2095 = vmatprep.mubr.f32.mxu1 %v1099_v43  ;;  %2320 = vmatprep.subr.bf16.mxu0 %v2319_v34 }
 0x44a   : > { %v1016_v35 = vpop.permute.xlu1 %1015  ;;  %2096 = vmatmul.mubr.f32.gmra.mrb[24].mxu1 %v1100_v28  ;;  %2330 = vmatprep.subr.bf16.mxu1 %v2319_v34  ;;  %v1698_v28 = vld [vmem:[#allocation5 + $0x2a0] ss:$0 sm:$0xff] }
 0x44b   : > { %v1049_v37 = vmul.f32 %v3064_v6, %v1016_v35  ;;  %2322 = vmatpush3.bf16.msra.mxu0 %v2319_v34  ;;  %2338 = vmatpush3.bf16.msra.mxu1 %v2319_v34 }
 0x44d   : > { %v1065_v42 = vadd.f32 %v1049_v37, %v965_v30 }
 0x44f   : > { %v923_v44 = vpop.permute.xlu1 %922  ;;  %v1086_v2 = vadd.f32 %v3074_v16, %v1065_v42 }
 0x450   : > { %v964_v47 = vmul.f32 %v3062_v3, %v923_v44 }
 0x451   : > { %v1102_v10 = vmax.f32 %v1086_v2, 0.0 }
 0x452   : > { %v1064_v49 = vadd.f32 %v1048_v62, %v964_v47 }
 0x453   : > { %v938_v1 = vpop.permute.xlu1 %937 }
 0x454   : > { %v967_v52 = vmul.f32 %v3062_v3, %v938_v1  ;;  %v1085_v50 = vadd.f32 %v3074_v16, %v1064_v49 }
 0x456   : > { %v1101_v51 = vmax.f32 %v1085_v50, 0.0  ;;  %v1067_v12 = vadd.f32 %v1051_v41, %v967_v52 }
 0x458   : > { %v1020_v54 = vpop.permute.xlu1 %1019  ;;  %2098 = vmatprep.mubr.f32.mxu1 %v1101_v51  ;;  %v1088_v55 = vadd.f32 %v3074_v16, %v1067_v12 }
 0x459   : > { %v1050_v14 = vmul.f32 %v3064_v6, %v1020_v54  ;;  %2099 = vmatmul.mubr.f32.gmra.mrb[26].mxu1 %v1102_v10 }
 0x45a   : > { %v1104_v20 = vmax.f32 %v1088_v55, 0.0 }
 0x45b   : > { %v1066_v0 = vadd.f32 %v1050_v14, %v966_v13 }
 0x45d   : > { %v943_v17 = vpop.permute.xlu1 %942  ;;  %v1087_v19 = vadd.f32 %v3074_v16, %v1066_v0 }
 0x45e   : > { %v968_v29 = vmul.f32 %v3062_v3, %v943_v17 }
 0x45f   : > { %v1103_v57 = vmax.f32 %v1087_v19, 0.0 }
 0x461   : > { %2101 = vmatprep.mubr.f32.mxu1 %v1103_v57 }
 0x462   : > { %v1028_v7 = vpop.permute.xlu1 %1027  ;;  %2102 = vmatmul.mubr.f32.gmra.mrb[28].mxu1 %v1104_v20 }
 0x463   : > { %v1052_v58 = vmul.f32 %v3064_v6, %v1028_v7 }
 0x465   : > { %v1068_v21 = vadd.f32 %v1052_v58, %v968_v29 }
 0x466   : > { %v1032_v53 = vpop.permute.xlu1 %1031 }
 0x467   : > { %v1053_v56 = vmul.f32 %v3064_v6, %v1032_v53  ;;  %v1089_v24 = vadd.f32 %v3074_v16, %v1068_v21 }
 0x469   : > { %v1069_v45 = vadd.f32 %v1053_v56, %v969_v23  ;;  %v1105_v25 = vmax.f32 %v1089_v24, 0.0 }
 0x46b   : > { %2104 = vmatprep.mubr.f32.mxu1 %v1105_v25  ;;  %v1090_v27 = vadd.f32 %v3074_v16, %v1069_v45 }
 0x46d   : > { %v1106_v43 = vmax.f32 %v1090_v27, 0.0 }
 0x46f   : > { %2105 = vmatmul.mubr.f32.gmra.mrb[30].mxu1 %v1106_v43 }
 0x4e9   : > { %v2085_v3 = vpop.f32.mrb[16].mxu1 }
 0x4ea   : > { %v1200_v35 = vadd.f32 %v2085_v3, %v1698_v28  ;;  %v1194_v6 = vpop.f32.mrb[17].mxu1 }
 0x4eb   : > { %v1195_v37 = vadd.f32 %v1698_v28, %v1194_v6  ;;  %v3134_v6 = vld [vmem:[#allocation5 + $0x328] ss:$0 sm:$0xff] }
 0x4ec   : > { %v1274_v30 = vmax.f32 %v1200_v35, 0.0 }
 0x4ed   : > { %v1273_v40 = vmax.f32 %v1195_v37, 0.0 }
 0x4ef   : > { %2139 = vmatprep.mubr.f32.mxu0 %v1273_v40 }
 0x4f0   : > { %2140 = vmatmul.mubr.f32.vlgmr.msra.gmra.mrb[32].mxu0 %v1274_v30 }
 0x4f7   : > { %v2088_v42 = vpop.f32.mrb[18].mxu1 }
 0x4f8   : > { %v1210_v44 = vadd.f32 %v2088_v42, %v1698_v28  ;;  %v1204_v62 = vpop.f32.mrb[19].mxu1 }
 0x4f9   : > { %v1205_v47 = vadd.f32 %v1698_v28, %v1204_v62 }
 0x4fa   : > { %v1276_v49 = vmax.f32 %v1210_v44, 0.0 }
 0x4fb   : > { %v1275_v16 = vmax.f32 %v1205_v47, 0.0 }
 0x4fd   : > { %2142 = vmatprep.mubr.f32.mxu0 %v1275_v16 }
 0x4fe   : > { %2143 = vmatmul.mubr.f32.gmra.mrb[34].mxu0 %v1276_v49 }
 0x506   : > { %v2091_v22 = vpop.f32.mrb[20].mxu1 }
 0x507   : > { %v1220_v1 = vadd.f32 %v2091_v22, %v1698_v28  ;;  %v1214_v2 = vpop.f32.mrb[21].mxu1 }
 0x508   : > { %v1215_v52 = vadd.f32 %v1698_v28, %v1214_v2 }
 0x509   : > { %v1278_v41 = vmax.f32 %v1220_v1, 0.0 }
 0x50a   : > { %v1277_v50 = vmax.f32 %v1215_v52, 0.0 }
 0x50c   : > { %2145 = vmatprep.mubr.f32.mxu0 %v1277_v50 }
 0x50d   : > { %2146 = vmatmul.mubr.f32.gmra.mrb[36].mxu0 %v1278_v41 }
 0x50f   : > { %v2094_v51 = vpop.f32.mrb[22].mxu1 }
 0x510   : > { %v1230_v10 = vadd.f32 %v2094_v51, %v1698_v28  ;;  %v1224_v12 = vpop.f32.mrb[23].mxu1  ;;  %v3141_v51 = vand.u32 127, %v950_v48 }
 0x511   : > { %v1225_v54 = vadd.f32 %v1698_v28, %v1224_v12 }
 0x512   : > { %v1280_v14 = vmax.f32 %v1230_v10, 0.0  ;;  %vm1553_vm0 = vcmp.lt.s32.totalorder %v3141_v51, 30 }
 0x513   : > { %v1279_v13 = vmax.f32 %v1225_v54, 0.0 }
 0x515   : > { %2148 = vmatprep.mubr.f32.mxu0 %v1279_v13 }
 0x516   : > { %2149 = vmatmul.mubr.f32.gmra.mrb[38].mxu0 %v1280_v14 }
 0x51d   : > { %v2097_v0 = vpop.f32.mrb[24].mxu1 }
 0x51e   : > { %v1240_v55 = vadd.f32 %v2097_v0, %v1698_v28  ;;  %v1234_v17 = vpop.f32.mrb[25].mxu1 }
 0x51f   : > { %v1235_v19 = vadd.f32 %v1698_v28, %v1234_v17 }
 0x520   : > { %v1282_v20 = vmax.f32 %v1240_v55, 0.0 }
 0x521   : > { %v1281_v57 = vmax.f32 %v1235_v19, 0.0 }
 0x523   : > { %2151 = vmatprep.mubr.f32.mxu1 %v1281_v57 }
 0x524   : > { %2152 = vmatmul.mubr.f32.vlgmr.msra.gmra.mrb[32].mxu1 %v1282_v20 }
 0x52c   : > { %v2100_v7 = vpop.f32.mrb[26].mxu1 }
 0x52d   : > { %v1250_v29 = vadd.f32 %v2100_v7, %v1698_v28  ;;  %v1244_v58 = vpop.f32.mrb[27].mxu1 }
 0x52e   : > { %v1245_v60 = vadd.f32 %v1698_v28, %v1244_v58 }
 0x52f   : > { %v1284_v53 = vmax.f32 %v1250_v29, 0.0 }
 0x530   : > { %v1283_v21 = vmax.f32 %v1245_v60, 0.0 }
 0x532   : > { %2154 = vmatprep.mubr.f32.mxu1 %v1283_v21 }
 0x533   : > { %2155 = vmatmul.mubr.f32.gmra.mrb[34].mxu1 %v1284_v53 }
 0x535   : > { %v2103_v23 = vpop.f32.mrb[28].mxu1 }
 0x536   : > { %v1260_v56 = vadd.f32 %v2103_v23, %v1698_v28  ;;  %v1254_v24 = vpop.f32.mrb[29].mxu1 }
 0x537   : > { %v1255_v45 = vadd.f32 %v1698_v28, %v1254_v24 }
 0x538   : > { %v1286_v9 = vmax.f32 %v1260_v56, 0.0 }
 0x539   : > { %v1285_v25 = vmax.f32 %v1255_v45, 0.0 }
 0x53b   : > { %2157 = vmatprep.mubr.f32.mxu1 %v1285_v25 }
 0x53c   : > { %2158 = vmatmul.mubr.f32.gmra.mrb[36].mxu1 %v1286_v9 }
 0x542   : > { %v2106_v59 = vpop.f32.mrb[30].mxu1 }
 0x543   : > { %v1270_v34 = vadd.f32 %v2106_v59, %v1698_v28  ;;  %v1264_v27 = vpop.f32.mrb[31].mxu1 }
 0x544   : > { %v1265_v43 = vadd.f32 %v1698_v28, %v1264_v27 }
 0x545   : > { %v1288_v35 = vmax.f32 %v1270_v34, 0.0 }
 0x546   : > { %v1287_v3 = vmax.f32 %v1265_v43, 0.0 }
 0x548   : > { %2160 = vmatprep.mubr.f32.mxu1 %v1287_v3 }
 0x549   : > { %2161 = vmatmul.mubr.f32.gmra.mrb[38].mxu1 %v1288_v35 }
 0x5c3   : > { %v2141_v37 = vpop.f32.mrb[32].mxu0 }
 0x5c4   : > { %v1382_v40 = vadd.f32 %v2141_v37, %v3134_v6  ;;  %v1376_v30 = vpop.f32.mrb[33].mxu0 }
 0x5c5   : > { %v1377_v42 = vadd.f32 %v3134_v6, %v1376_v30 }
 0x5c6   : > { %v1701_v44 = vmul.f32 -1.442695, %v1382_v40 }
 0x5c7   : > { %v1700_v62 = vmul.f32 -1.442695, %v1377_v42 }
 0x5c8   : > { %2460 = vpow2.f32 %v1701_v44 }
 0x5c9   : > { %2462 = vpow2.f32 %v1700_v62 }
 0x5d1   : > { %v2144_v47 = vpop.f32.mrb[34].mxu0 }
 0x5d2   : > { %v2461_v16 = vpop.eup %2460  ;;  %v1392_v28 = vadd.f32 %v2144_v47, %v3134_v6  ;;  %v1386_v49 = vpop.f32.mrb[35].mxu0 }
 0x5d3   : > { %v2463_v22 = vpop.eup %2462  ;;  %v1504_v1 = vadd.f32 1.0, %v2461_v16  ;;  %v1387_v2 = vadd.f32 %v3134_v6, %v1386_v49 }
 0x5d4   : > { %v1503_v52 = vadd.f32 1.0, %v2463_v22  ;;  %v1703_v50 = vmul.f32 -1.442695, %v1392_v28 }
 0x5d5   : > { %2464 = vrcp.f32 %v1504_v1  ;;  %v1702_v41 = vmul.f32 -1.442695, %v1387_v2 }
 0x5d6   : > { %2466 = vrcp.f32 %v1503_v52 }
 0x5d7   : > { %2468 = vpow2.f32 %v1703_v50 }
 0x5d8   : > { %2470 = vpow2.f32 %v1702_v41 }
 0x5df   : > { %v2465_v10 = vpop.eup %2464 }
 0x5e0   : > { %v2467_v12 = vpop.eup %2466  ;;  %v1555_v54 = vsel %vm1553_vm0, %v2465_v10, %v2907_v31  ;;  %v2147_v13 = vpop.f32.mrb[36].mxu0 }
 0x5e1   : > { %v2469_v14 = vpop.eup %2468  ;;  %1571 = vst [vmem:[%s3149_s17 + $0x8] sm:$0xff] %v1555_v54  ;;  %v1554_v48 = vsel %vm1553_vm0, %v2467_v12, %v2910_v33  ;;  %v1402_v0 = vadd.f32 %v2147_v13, %v3134_v6  ;;  %v1396_v55 = vpop.f32.mrb[37].mxu0 }
 0x5e2   : > { %v2471_v17 = vpop.eup %2470  ;;  %1570 = vst [vmem:[%s3149_s17] sm:$0xff] %v1554_v48  ;;  %v1506_v19 = vadd.f32 1.0, %v2469_v14  ;;  %v1397_v31 = vadd.f32 %v3134_v6, %v1396_v55 }
 0x5e3   : > { %v1505_v57 = vadd.f32 1.0, %v2471_v17  ;;  %v1705_v20 = vmul.f32 -1.442695, %v1402_v0 }
 0x5e4   : > { %2472 = vrcp.f32 %v1506_v19  ;;  %v1704_v7 = vmul.f32 -1.442695, %v1397_v31 }
 0x5e5   : > { %2474 = vrcp.f32 %v1505_v57 }
 0x5e6   : > { %2476 = vpow2.f32 %v1705_v20 }
 0x5e7   : > { %2478 = vpow2.f32 %v1704_v7 }
 0x5e9   : > { %v2150_v29 = vpop.f32.mrb[38].mxu0 }
 0x5ea   : > { %v1412_v33 = vadd.f32 %v2150_v29, %v3134_v6  ;;  %v1406_v58 = vpop.f32.mrb[39].mxu0 }
 0x5eb   : > { %v1407_v60 = vadd.f32 %v3134_v6, %v1406_v58 }
 0x5ec   : > { %v1707_v21 = vmul.f32 -1.442695, %v1412_v33 }
 0x5ed   : > { %v1706_v53 = vmul.f32 -1.442695, %v1407_v60 }
 0x5ee   : > { %v2473_v23 = vpop.eup %2472  ;;  %2480 = vpow2.f32 %v1707_v21 }
 0x5ef   : > { %v2475_v56 = vpop.eup %2474  ;;  %v1557_v24 = vsel %vm1553_vm0, %v2473_v23, %v2915_v36  ;;  %2482 = vpow2.f32 %v1706_v53 }
 0x5f0   : > { %v2477_v45 = vpop.eup %2476  ;;  %1573 = vst [vmem:[%s3149_s17 + $0x18] sm:$0xff] %v1557_v24  ;;  %v1556_v25 = vsel %vm1553_vm0, %v2475_v56, %v2918_v39 }
 0x5f1   : > { %v2479_v9 = vpop.eup %2478  ;;  %1572 = vst [vmem:[%s3149_s17 + $0x10] sm:$0xff] %v1556_v25  ;;  %v1508_v59 = vadd.f32 1.0, %v2477_v45 }
 0x5f2   : > { %v1507_v34 = vadd.f32 1.0, %v2479_v9 }
 0x5f3   : > { %2484 = vrcp.f32 %v1508_v59 }
 0x5f4   : > { %2486 = vrcp.f32 %v1507_v34 }
 0x5f7   : > { %v2153_v27 = vpop.f32.mrb[32].mxu1 }
 0x5f8   : > { %v2481_v43 = vpop.eup %2480  ;;  %v1422_v3 = vadd.f32 %v2153_v27, %v3134_v6  ;;  %v1416_v35 = vpop.f32.mrb[33].mxu1 }
 0x5f9   : > { %v2483_v36 = vpop.eup %2482  ;;  %v1510_v37 = vadd.f32 1.0, %v2481_v43  ;;  %v1417_v40 = vadd.f32 %v3134_v6, %v1416_v35 }
 0x5fa   : > { %v1509_v30 = vadd.f32 1.0, %v2483_v36  ;;  %v1709_v42 = vmul.f32 -1.442695, %v1422_v3 }
 0x5fb   : > { %2488 = vrcp.f32 %v1510_v37  ;;  %v1708_v39 = vmul.f32 -1.442695, %v1417_v40 }
 0x5fc   : > { %2490 = vrcp.f32 %v1509_v30 }
 0x5fd   : > { %v2485_v44 = vpop.eup %2484  ;;  %2492 = vpow2.f32 %v1709_v42 }
 0x5fe   : > { %v2487_v62 = vpop.eup %2486  ;;  %v1559_v47 = vsel %vm1553_vm0, %v2485_v44, %v2925_v61  ;;  %2494 = vpow2.f32 %v1708_v39 }
 0x5ff   : > { %1575 = vst [vmem:[%s3149_s17 + $0x28] sm:$0xff] %v1559_v47  ;;  %v1558_v16 = vsel %vm1553_vm0, %v2487_v62, %v2928_v63 }
 0x600   : > { %1574 = vst [vmem:[%s3149_s17 + $0x20] sm:$0xff] %v1558_v16 }
 0x605   : > { %v2489_v28 = vpop.eup %2488 }
 0x606   : > { %v2491_v49 = vpop.eup %2490  ;;  %v1561_v22 = vsel %vm1553_vm0, %v2489_v28, %v2933_v5  ;;  %v2156_v1 = vpop.f32.mrb[34].mxu1 }
 0x607   : > { %v2493_v2 = vpop.eup %2492  ;;  %1577 = vst [vmem:[%s3149_s17 + $0x38] sm:$0xff] %v1561_v22  ;;  %v1560_v61 = vsel %vm1553_vm0, %v2491_v49, %v2936_v8  ;;  %v1432_v52 = vadd.f32 %v2156_v1, %v3134_v6  ;;  %v1426_v50 = vpop.f32.mrb[35].mxu1 }
 0x608   : > { %v2495_v41 = vpop.eup %2494  ;;  %1576 = vst [vmem:[%s3149_s17 + $0x30] sm:$0xff] %v1560_v61  ;;  %v1512_v63 = vadd.f32 1.0, %v2493_v2  ;;  %v1427_v10 = vadd.f32 %v3134_v6, %v1426_v50 }
 0x609   : > { %v1511_v12 = vadd.f32 1.0, %v2495_v41  ;;  %v1711_v54 = vmul.f32 -1.442695, %v1432_v52 }
 0x60a   : > { %2496 = vrcp.f32 %v1512_v63  ;;  %v1710_v13 = vmul.f32 -1.442695, %v1427_v10 }
 0x60b   : > { %2498 = vrcp.f32 %v1511_v12 }
 0x60c   : > { %2500 = vpow2.f32 %v1711_v54 }
 0x60d   : > { %2502 = vpow2.f32 %v1710_v13 }
 0x60f   : > { %v2159_v5 = vpop.f32.mrb[36].mxu1 }
 0x610   : > { %v1442_v8 = vadd.f32 %v2159_v5, %v3134_v6  ;;  %v1436_v14 = vpop.f32.mrb[37].mxu1 }
 0x611   : > { %v1437_v48 = vadd.f32 %v3134_v6, %v1436_v14 }
 0x612   : > { %v1713_v0 = vmul.f32 -1.442695, %v1442_v8 }
 0x613   : > { %v1712_v55 = vmul.f32 -1.442695, %v1437_v48 }
 0x614   : > { %v2497_v17 = vpop.eup %2496  ;;  %2504 = vpow2.f32 %v1713_v0 }
 0x615   : > { %v2499_v19 = vpop.eup %2498  ;;  %v1563_v31 = vsel %vm1553_vm0, %v2497_v17, %v2941_v15  ;;  %2506 = vpow2.f32 %v1712_v55 }
 0x616   : > { %v2501_v57 = vpop.eup %2500  ;;  %1579 = vst [vmem:[%s3149_s17 + $0x48] sm:$0xff] %v1563_v31  ;;  %v1562_v20 = vsel %vm1553_vm0, %v2499_v19, %v2944_v18 }
 0x617   : > { %v2503_v7 = vpop.eup %2502  ;;  %1578 = vst [vmem:[%s3149_s17 + $0x40] sm:$0xff] %v1562_v20  ;;  %v1514_v29 = vadd.f32 1.0, %v2501_v57 }
 0x618   : > { %v1513_v33 = vadd.f32 1.0, %v2503_v7 }
 0x619   : > { %2508 = vrcp.f32 %v1514_v29 }
 0x61a   : > { %2510 = vrcp.f32 %v1513_v33 }
 0x61c   : > { %v2162_v58 = vpop.f32.mrb[38].mxu1 }
 0x61d   : > { %v1452_v60 = vadd.f32 %v2162_v58, %v3134_v6  ;;  %v1446_v21 = vpop.f32.mrb[39].mxu1 }
 0x61e   : > { %v2505_v53 = vpop.eup %2504  ;;  %v1447_v15 = vadd.f32 %v3134_v6, %v1446_v21 }
 0x61f   : > { %v2507_v23 = vpop.eup %2506  ;;  %v1516_v56 = vadd.f32 1.0, %v2505_v53  ;;  %v1715_v24 = vmul.f32 -1.442695, %v1452_v60 }
 0x620   : > { %v1515_v45 = vadd.f32 1.0, %v2507_v23  ;;  %v1714_v18 = vmul.f32 -1.442695, %v1447_v15 }
 0x621   : > { %2512 = vrcp.f32 %v1516_v56 }
 0x622   : > { %2514 = vrcp.f32 %v1515_v45 }
 0x623   : > { %v2509_v25 = vpop.eup %2508  ;;  %2516 = vpow2.f32 %v1715_v24 }
 0x624   : > { %v2511_v9 = vpop.eup %2510  ;;  %v1565_v59 = vsel %vm1553_vm0, %v2509_v25, %v2950_v26  ;;  %2518 = vpow2.f32 %v1714_v18 }
 0x625   : > { %1581 = vst [vmem:[%s3149_s17 + $0x58] sm:$0xff] %v1565_v59  ;;  %v1564_v6 = vsel %vm1553_vm0, %v2511_v9, %v2953_v32 }
 0x626   : > { %1580 = vst [vmem:[%s3149_s17 + $0x50] sm:$0xff] %v1564_v6 }
 0x62b   : > { %v2513_v34 = vpop.eup %2512 }
 0x62c   : > { %v2515_v27 = vpop.eup %2514  ;;  %v1567_v43 = vsel %vm1553_vm0, %v2513_v34, %v2960_v38 }
 0x62d   : > { %v2517_v3 = vpop.eup %2516  ;;  %1583 = vst [vmem:[%s3149_s17 + $0x68] sm:$0xff] %v1567_v43  ;;  %v1566_v26 = vsel %vm1553_vm0, %v2515_v27, %v2963_v46 }
 0x62e   : > { %v2519_v35 = vpop.eup %2518  ;;  %1582 = vst [vmem:[%s3149_s17 + $0x60] sm:$0xff] %v1566_v26  ;;  %v1518_v36 = vadd.f32 1.0, %v2517_v3 }
 0x62f   : > { %v1517_v32 = vadd.f32 1.0, %v2519_v35 }
 0x630   : > { %2520 = vrcp.f32 %v1518_v36 }
 0x631   : > { %2522 = vrcp.f32 %v1517_v32 }
 0x63a   : > { %v2521_v37 = vpop.eup %2520 }
 0x63b   : > { %v2523_v38 = vpop.eup %2522  ;;  %v1569_v46 = vsel %vm1553_vm0, %v2521_v37, %v2970_v4 }
 0x63c   : > { %1585 = vst [vmem:[%s3149_s17 + $0x78] sm:$0xff] %v1569_v46  ;;  %v1568_v40 = vsel %vm1553_vm0, %v2523_v38, %v2973_v11 }
 0x63d   : > { %1584 = vst [vmem:[%s3149_s17 + $0x70] sm:$0xff] %v1568_v40 }
 0x63e   : > { %2595 = shalt.err (!%p2592_p7)
}
 0x63f   : > { %s2596_s18 = scalar_lea.hbm %s3221_s28, 2048  ;;  %s2600_s26 = scalar_lea.hbm %s3277_s2, 4096 }
 0x640   : > { %p2597_p9 = scmp.ne.s32.totalorder %s3221_s28, %s2596_s18  ;;  %p2601_p5 = scmp.lt.u32.totalorder %s3221_s28, %s3277_s2 }
 0x641   : > { %p2602_p11 = scmp.lt.u32.totalorder %s2600_s26, %s2596_s18  ;;  %p2604_p4 = scmp.lt.u32.totalorder %s2596_s18, %s3221_s28 }
 0x642   : > { %p2598_p1 = pnand %p2597_p9, %p2773_p12 }
 0x643   : > { %p2603_p2 = por %p2602_p11, %p2601_p5 }
 0x644   : > { %p2599_p0 = pneg %p2598_p1 }
 0x645   : > { %p2605_p6 = por %p2604_p4, %p2603_p2 }
 0x647   : > { %p2606_p8 = pnand %p2605_p6, %p2599_p0 }
 0x649   : > { %2609 = shalt.err (!%p2606_p8)
}
 0x64a   : > { %s2662_s23 = smov 128   ;;  %s2663_s15 = smov 8  }
 0x64b   : > { %2345 = dma.vmem_to_hbm [thread:$0]  (%p2773_p12), %s3223_s5, 2048, %s3221_s28, %s1587_s13, %s2662_s23, %s2662_s23, %s2663_s15  }
 0x64c PF: > { %s1615_s17 = sand.u32 1, %s2640_s9   ;;  %p3292_p10 = scmp.ne.s32.totalorder %s3282_s16, 0 }
 0x64d   : > { %p3293_p13 = scmp.ge.s32.totalorder %s2652_s12, 2  ;;  %s1616_s4 = scalar_lea.sflag [#allocation4], %s1615_s17 }
 0x64f   : > { %p2356_p3 = pnand %p3293_p13, %p3292_p10 }
 0x651   : > { %2635 = dma.done.wait (!%p2356_p3), %s1616_s4, 2048  }
 0x652   : > { %2637 = vsyncadd (!%p2356_p3), %s1616_s4, 4294965248  ;;  %p16_p7 = scmp.ge.s32.totalorder %s2735_s21, 4   ;;  %s3294_s9 = smov %s2644_s10 }
 0x653   : > { %s3295_s10 = smov %s2648_s11  ;;  %s3296_s11 = smov %s2769_s8 }
 0x654   : > { %s3297_s12 = smov %s2735_s21  ;;  %18 = sbr.rel (!%p16_p7) target bundleno = 6 (0x6), region = 77 }
 0x65b   :  { %1621 = vsyncpa [#allocation3], 1 }
 0x65c   :  { %1623 = vsyncpa [#allocation3 + $0x1], 1 }
 0x65d   :  { %1624 = vsyncpa [#allocation6], 1 }
 0x65e   :  { %1625 = vsyncpa [#allocation4], 1 }
 0x65f   :  { %1627 = vsyncpa [#allocation4 + $0x1], 1 }

</bundles_post_ra>
